<compile_context>
chip_gen: v7x
topology: tpu7x:2x2x1
jax: 0.10.0
libtpu: 0.0.40
codegen_flags: <defaults>
</compile_context>

<pallas_src>
import functools

import jax
import jax.numpy as jnp
from jax.experimental import pallas as pl
from jax.experimental.pallas import tpu as pltpu

IN_DIM = 336
HID = 512
OUT_DIM = 2

IN_PAD = 384    # 3 * 128 lanes
OUT_PAD = 128   # lane-dense final layer


def _round_up(n, m):
    return ((n + m - 1) // m) * m


def mlp_sell_kernel(x_ref,
                    w1_ref, b1_ref,
                    w2_ref, b2_ref,
                    w3_ref, b3_ref,
                    w4_ref, b4_ref,
                    o_ref):
    bf16 = jnp.bfloat16

    # layer 1: (TB,384)bf16 @ (384,512)bf16 -> f32, + bias, ReLU
    h = jnp.dot(x_ref[...].astype(bf16), w1_ref[...],
                preferred_element_type=jnp.float32) + b1_ref[...]
    h = jnp.maximum(h, 0.0)

    # layer 2: (TB,512) @ (512,512), ReLU
    h = jnp.dot(h.astype(bf16), w2_ref[...],
                preferred_element_type=jnp.float32) + b2_ref[...]
    h = jnp.maximum(h, 0.0)

    # layer 3: (TB,512) @ (512,512), ReLU
    h = jnp.dot(h.astype(bf16), w3_ref[...],
                preferred_element_type=jnp.float32) + b3_ref[...]
    h = jnp.maximum(h, 0.0)

    # layer 4 (no activation), lane-dense padded output: (TB,512) @ (512,128)
    out = jnp.dot(h.astype(bf16), w4_ref[...],
                  preferred_element_type=jnp.float32) + b4_ref[...]
    o_ref[...] = out.astype(o_ref.dtype)


def prepare_params(params):
    """Cast weights to bf16 and pad (336->384 rows of w1, 2->128 cols of w4).

    Zero padding preserves semantics exactly: padded x lanes are zero and
    padded output lanes are sliced away in the wrapper.
    """
    (w1, b1, w2, b2, w3, b3, w4, b4) = params
    bf16 = jnp.bfloat16

    w1p = jnp.zeros((IN_PAD, HID), bf16).at[:IN_DIM, :].set(w1.astype(bf16))
    w4p = jnp.zeros((HID, OUT_PAD), bf16).at[:, :OUT_DIM].set(w4.astype(bf16))
    b4p = jnp.zeros((1, OUT_PAD), jnp.float32).at[:, :OUT_DIM].set(b4)

    return (w1p, b1.astype(jnp.float32),
            w2.astype(bf16), b2.astype(jnp.float32),
            w3.astype(bf16), b3.astype(jnp.float32),
            w4p, b4p)


@functools.partial(jax.jit, static_argnames=("tb",))
def nn_model_sell_forward(x, prep_params, tb=128):
    """x: (B, 336) float32 -> (B, 2) float32. prep_params from prepare_params."""
    (w1, b1, w2, b2, w3, b3, w4, b4) = prep_params
    B = x.shape[0]

    # Batch tile: multiple of 8 sublanes; cap at `tb` rows (128 by default).
    TB = min(tb, _round_up(B, 8))
    Bp = _round_up(B, TB)
    num_tiles = Bp // TB

    # Pad activations: batch rows to Bp, features 336 -> 384 (zero lanes).
    xp = jnp.zeros((Bp, IN_PAD), jnp.float32).at[:B, :IN_DIM].set(x)

    full = lambda a: pl.BlockSpec(a.shape, lambda i: (0,) * a.ndim)

    out = pl.pallas_call(
        mlp_sell_kernel,
        out_shape=jax.ShapeDtypeStruct((Bp, OUT_PAD), jnp.float32),
        grid=(num_tiles,),
        in_specs=[pl.BlockSpec((TB, IN_PAD), lambda i: (i, 0)),
                  full(w1), full(b1),
                  full(w2), full(b2),
                  full(w3), full(b3),
                  full(w4), full(b4)],
        out_specs=pl.BlockSpec((TB, OUT_PAD), lambda i: (i, 0)),
        compiler_params=pltpu.CompilerParams(
            dimension_semantics=("parallel",)),
    )(xp, w1, b1, w2, b2, w3, b3, w4, b4)

    return out[:B, :OUT_DIM]


def init_params(key):
    """Deterministic init mimicking nn.Linear's U(-1/sqrt(fan_in), 1/sqrt(fan_in))."""
    dims = [(IN_DIM, HID), (HID, HID), (HID, HID), (HID, OUT_DIM)]
    params = []
    keys = jax.random.split(key, 2 * len(dims))
    for i, (fan_in, fan_out) in enumerate(dims):
        bound = 1.0 / jnp.sqrt(jnp.float32(fan_in))
        w = jax.random.uniform(keys[2 * i], (fan_in, fan_out),
                               minval=-bound, maxval=bound, dtype=jnp.float32)
        b = jax.random.uniform(keys[2 * i + 1], (1, fan_out),
                               minval=-bound, maxval=bound, dtype=jnp.float32)
        params.extend([w, b])
    return tuple(params)


def reference_forward_bf16(x, params):
    """Mirror of the kernel numerics: bf16 weights/activations, f32 accum."""
    (w1, b1, w2, b2, w3, b3, w4, b4) = params
    bf16 = jnp.bfloat16

    def dot32(a, b):
        return jnp.dot(a.astype(bf16), b.astype(bf16),
                       preferred_element_type=jnp.float32)

    h = jax.nn.relu(dot32(x, w1) + b1)
    h = jax.nn.relu(dot32(h, w2) + b2)
    h = jax.nn.relu(dot32(h, w3) + b3)
    return dot32(h, w4) + b4


def reference_forward_f32(x, params):
    (w1, b1, w2, b2, w3, b3, w4, b4) = params
    h = jax.nn.relu(x @ w1 + b1)
    h = jax.nn.relu(h @ w2 + b2)
    h = jax.nn.relu(h @ w3 + b3)
    return h @ w4 + b4


if __name__ == "__main__":
    key = jax.random.PRNGKey(0)
    k_x, k_p = jax.random.split(key)

    B = 8
    x = jax.random.normal(k_x, (B, IN_DIM), dtype=jnp.float32)
    params = init_params(k_p)
    prep = prepare_params(params)

    out = nn_model_sell_forward(x, prep)
    out = jax.block_until_ready(out)
    assert out.shape == (B, OUT_DIM)

    # Exact-semantics check against a bf16-mirror reference (same quantization
    # as the kernel, differing only in accumulation order).
    ref_bf16 = reference_forward_bf16(x, params)
    assert jnp.allclose(out, ref_bf16, atol=1e-2, rtol=1e-2)

    # Sanity check against the full-f32 PyTorch-equivalent forward (loose
    # tolerance: weights are quantized to bf16 inside the kernel).
    ref_f32 = reference_forward_f32(x, params)
    assert jnp.allclose(out, ref_f32, atol=8e-2, rtol=8e-2)

    print("KERNEL_OK")
</pallas_src>

<mosaic_0001>
module attributes {stable_mosaic.version = 11 : i64} {
  func.func @mlp_sell_kernel(%arg0: i32, %arg1: memref<8x384xf32, #tpu.memory_space<vmem>>, %arg2: memref<384x512xbf16, #tpu.memory_space<vmem>>, %arg3: memref<1x512xf32, #tpu.memory_space<vmem>>, %arg4: memref<512x512xbf16, #tpu.memory_space<vmem>>, %arg5: memref<1x512xf32, #tpu.memory_space<vmem>>, %arg6: memref<512x512xbf16, #tpu.memory_space<vmem>>, %arg7: memref<1x512xf32, #tpu.memory_space<vmem>>, %arg8: memref<512x128xbf16, #tpu.memory_space<vmem>>, %arg9: memref<1x128xf32, #tpu.memory_space<vmem>>, %arg10: memref<8x128xf32, #tpu.memory_space<vmem>>) attributes {dimension_semantics = [#tpu.dimension_semantics<parallel>], iteration_bounds = array<i64: 1>, scalar_prefetch = 0 : i64, scratch_operands = 0 : i64, tpu.core_type = #tpu.core_type<tc>, window_params = [{transform_indices = @transform_0, window_bounds = array<i64: 8, 384>}, {pipeline_mode = #tpu.pipeline_mode<synchronous>, transform_indices = @transform_1, window_bounds = array<i64: 384, 512>}, {pipeline_mode = #tpu.pipeline_mode<synchronous>, transform_indices = @transform_2, window_bounds = array<i64: 1, 512>}, {pipeline_mode = #tpu.pipeline_mode<synchronous>, transform_indices = @transform_3, window_bounds = array<i64: 512, 512>}, {pipeline_mode = #tpu.pipeline_mode<synchronous>, transform_indices = @transform_4, window_bounds = array<i64: 1, 512>}, {pipeline_mode = #tpu.pipeline_mode<synchronous>, transform_indices = @transform_5, window_bounds = array<i64: 512, 512>}, {pipeline_mode = #tpu.pipeline_mode<synchronous>, transform_indices = @transform_6, window_bounds = array<i64: 1, 512>}, {pipeline_mode = #tpu.pipeline_mode<synchronous>, transform_indices = @transform_7, window_bounds = array<i64: 512, 128>}, {pipeline_mode = #tpu.pipeline_mode<synchronous>, transform_indices = @transform_8, window_bounds = array<i64: 1, 128>}, {transform_indices = @transform_9, window_bounds = array<i64: 8, 128>}]} {
    %c0 = arith.constant 0 : index
    %c0_0 = arith.constant 0 : index
    %0 = vector.load %arg1[%c0, %c0_0] : memref<8x384xf32, #tpu.memory_space<vmem>>, vector<8x384xf32>
    %1 = arith.truncf %0 : vector<8x384xf32> to vector<8x384xbf16>
    %c0_1 = arith.constant 0 : index
    %c0_2 = arith.constant 0 : index
    %2 = vector.load %arg2[%c0_1, %c0_2] : memref<384x512xbf16, #tpu.memory_space<vmem>>, vector<384x512xbf16>
    %cst = arith.constant dense<0.000000e+00> : vector<8x512xf32>
    %3 = tpu.matmul %1, %2, %cst {dimension_numbers = #tpu.dot_dimension_numbers<[1], [0], [0], [1], [0, 0, 1, 1], [], []>} : vector<8x384xbf16>, vector<384x512xbf16>, vector<8x512xf32> -> vector<8x512xf32>
    %c0_3 = arith.constant 0 : index
    %c0_4 = arith.constant 0 : index
    %4 = vector.load %arg3[%c0_3, %c0_4] : memref<1x512xf32, #tpu.memory_space<vmem>>, vector<1x512xf32>
    %5 = vector.broadcast %4 : vector<1x512xf32> to vector<8x512xf32>
    %6 = arith.addf %3, %5 : vector<8x512xf32>
    %cst_5 = arith.constant 0.000000e+00 : f32
    %7 = vector.broadcast %cst_5 : f32 to vector<8x512xf32>
    %8 = arith.maximumf %6, %7 : vector<8x512xf32>
    %9 = arith.truncf %8 : vector<8x512xf32> to vector<8x512xbf16>
    %c0_6 = arith.constant 0 : index
    %c0_7 = arith.constant 0 : index
    %10 = vector.load %arg4[%c0_6, %c0_7] : memref<512x512xbf16, #tpu.memory_space<vmem>>, vector<512x512xbf16>
    %cst_8 = arith.constant dense<0.000000e+00> : vector<8x512xf32>
    %11 = tpu.matmul %9, %10, %cst_8 {dimension_numbers = #tpu.dot_dimension_numbers<[1], [0], [0], [1], [0, 0, 1, 1], [], []>} : vector<8x512xbf16>, vector<512x512xbf16>, vector<8x512xf32> -> vector<8x512xf32>
    %c0_9 = arith.constant 0 : index
    %c0_10 = arith.constant 0 : index
    %12 = vector.load %arg5[%c0_9, %c0_10] : memref<1x512xf32, #tpu.memory_space<vmem>>, vector<1x512xf32>
    %13 = vector.broadcast %12 : vector<1x512xf32> to vector<8x512xf32>
    %14 = arith.addf %11, %13 : vector<8x512xf32>
    %cst_11 = arith.constant 0.000000e+00 : f32
    %15 = vector.broadcast %cst_11 : f32 to vector<8x512xf32>
    %16 = arith.maximumf %14, %15 : vector<8x512xf32>
    %17 = arith.truncf %16 : vector<8x512xf32> to vector<8x512xbf16>
    %c0_12 = arith.constant 0 : index
    %c0_13 = arith.constant 0 : index
    %18 = vector.load %arg6[%c0_12, %c0_13] : memref<512x512xbf16, #tpu.memory_space<vmem>>, vector<512x512xbf16>
    %cst_14 = arith.constant dense<0.000000e+00> : vector<8x512xf32>
    %19 = tpu.matmul %17, %18, %cst_14 {dimension_numbers = #tpu.dot_dimension_numbers<[1], [0], [0], [1], [0, 0, 1, 1], [], []>} : vector<8x512xbf16>, vector<512x512xbf16>, vector<8x512xf32> -> vector<8x512xf32>
    %c0_15 = arith.constant 0 : index
    %c0_16 = arith.constant 0 : index
    %20 = vector.load %arg7[%c0_15, %c0_16] : memref<1x512xf32, #tpu.memory_space<vmem>>, vector<1x512xf32>
    %21 = vector.broadcast %20 : vector<1x512xf32> to vector<8x512xf32>
    %22 = arith.addf %19, %21 : vector<8x512xf32>
    %cst_17 = arith.constant 0.000000e+00 : f32
    %23 = vector.broadcast %cst_17 : f32 to vector<8x512xf32>
    %24 = arith.maximumf %22, %23 : vector<8x512xf32>
    %25 = arith.truncf %24 : vector<8x512xf32> to vector<8x512xbf16>
    %c0_18 = arith.constant 0 : index
    %c0_19 = arith.constant 0 : index
    %26 = vector.load %arg8[%c0_18, %c0_19] : memref<512x128xbf16, #tpu.memory_space<vmem>>, vector<512x128xbf16>
    %cst_20 = arith.constant dense<0.000000e+00> : vector<8x128xf32>
    %27 = tpu.matmul %25, %26, %cst_20 {dimension_numbers = #tpu.dot_dimension_numbers<[1], [0], [0], [1], [0, 0, 1, 1], [], []>} : vector<8x512xbf16>, vector<512x128xbf16>, vector<8x128xf32> -> vector<8x128xf32>
    %c0_21 = arith.constant 0 : index
    %c0_22 = arith.constant 0 : index
    %28 = vector.load %arg9[%c0_21, %c0_22] : memref<1x128xf32, #tpu.memory_space<vmem>>, vector<1x128xf32>
    %29 = vector.broadcast %28 : vector<1x128xf32> to vector<8x128xf32>
    %30 = arith.addf %27, %29 : vector<8x128xf32>
    %c0_23 = arith.constant 0 : index
    %c0_24 = arith.constant 0 : index
    %31 = vector.load %arg10[%c0_23, %c0_24] : memref<8x128xf32, #tpu.memory_space<vmem>>, vector<8x128xf32>
    tpu.vector_store %arg10[%c0_23, %c0_24], %30 {strides = array<i32>} : memref<8x128xf32, #tpu.memory_space<vmem>>, vector<8x128xf32>,
    return
  }
  func.func @transform_0(%arg0: i32) -> (i32, i32) {
    %c0_i32 = arith.constant 0 : i32
    %c0_i32_0 = arith.constant 0 : i32
    return %arg0, %c0_i32 : i32, i32
  }
  func.func @transform_1(%arg0: i32) -> (i32, i32) {
    %c0_i32 = arith.constant 0 : i32
    %c0_i32_0 = arith.constant 0 : i32
    %c0_i32_1 = arith.constant 0 : i32
    return %c0_i32, %c0_i32_0 : i32, i32
  }
  func.func @transform_2(%arg0: i32) -> (i32, i32) {
    %c0_i32 = arith.constant 0 : i32
    %c0_i32_0 = arith.constant 0 : i32
    %c0_i32_1 = arith.constant 0 : i32
    return %c0_i32, %c0_i32_0 : i32, i32
  }
  func.func @transform_3(%arg0: i32) -> (i32, i32) {
    %c0_i32 = arith.constant 0 : i32
    %c0_i32_0 = arith.constant 0 : i32
    %c0_i32_1 = arith.constant 0 : i32
    return %c0_i32, %c0_i32_0 : i32, i32
  }
  func.func @transform_4(%arg0: i32) -> (i32, i32) {
    %c0_i32 = arith.constant 0 : i32
    %c0_i32_0 = arith.constant 0 : i32
    %c0_i32_1 = arith.constant 0 : i32
    return %c0_i32, %c0_i32_0 : i32, i32
  }
  func.func @transform_5(%arg0: i32) -> (i32, i32) {
    %c0_i32 = arith.constant 0 : i32
    %c0_i32_0 = arith.constant 0 : i32
    %c0_i32_1 = arith.constant 0 : i32
    return %c0_i32, %c0_i32_0 : i32, i32
  }
  func.func @transform_6(%arg0: i32) -> (i32, i32) {
    %c0_i32 = arith.constant 0 : i32
    %c0_i32_0 = arith.constant 0 : i32
    %c0_i32_1 = arith.constant 0 : i32
    return %c0_i32, %c0_i32_0 : i32, i32
  }
  func.func @transform_7(%arg0: i32) -> (i32, i32) {
    %c0_i32 = arith.constant 0 : i32
    %c0_i32_0 = arith.constant 0 : i32
    %c0_i32_1 = arith.constant 0 : i32
    return %c0_i32, %c0_i32_0 : i32, i32
  }
  func.func @transform_8(%arg0: i32) -> (i32, i32) {
    %c0_i32 = arith.constant 0 : i32
    %c0_i32_0 = arith.constant 0 : i32
    %c0_i32_1 = arith.constant 0 : i32
    return %c0_i32, %c0_i32_0 : i32, i32
  }
  func.func @transform_9(%arg0: i32) -> (i32, i32) {
    %c0_i32 = arith.constant 0 : i32
    %c0_i32_0 = arith.constant 0 : i32
    return %arg0, %c0_i32 : i32, i32
  }
}

</mosaic_0001>

<bundles_post_ra>
// kernel: nn_model_sell_forward.1
= control target key start
LH: loop header
LB: loop body
LE: loop exit
PB: predicated region body
PF: predicated region fallthrough
CT: control target
= control target key end

     0   :  { %14 = vsyncpa [#allocation3], 0  ;;  %s4465_s0 = inlined_call_operand.vmem [shape: f32[8,384], index: 0, kind: input, shape index: {}]   ;;  %s4466_s1 = inlined_call_operand.hbm [shape: bf16[384,512], index: 1, kind: input, shape index: {}]   ;;  %s4467_s2 = inlined_call_operand.vmem [shape: f32[1,512], index: 2, kind: input, shape index: {}]   ;;  %s4468_s3 = inlined_call_operand.hbm [shape: bf16[512,512], index: 3, kind: input, shape index: {}]   ;;  %s4469_s4 = inlined_call_operand.vmem [shape: f32[1,512], index: 4, kind: input, shape index: {}]   ;;  %s4470_s5 = inlined_call_operand.hbm [shape: bf16[512,512], index: 5, kind: input, shape index: {}]   ;;  %s4471_s6 = inlined_call_operand.vmem [shape: f32[1,512], index: 6, kind: input, shape index: {}]   ;;  %s4472_s7 = inlined_call_operand.hbm [shape: bf16[512,128], index: 7, kind: input, shape index: {}]   ;;  %s4473_s8 = inlined_call_operand.vmem [shape: f32[1,128], index: 8, kind: input, shape index: {}]   ;;  %s4474_s9 = inlined_call_operand.vmem [shape: f32[8,128], index: 9, kind: output, shape index: {}]  }
   0x1   :  { %15 = vsyncpa [#allocation5], 0 }
   0x2   :  { %16 = vsyncpa [#allocation8], 0  ;;  %s4267_s30 = smov [#allocation4]   ;;  %s4268_s11 = smov [#allocation2]  }
   0x3   :  { %s38_s10 = sshll.u32 %s4267_s30, 4  ;;  %s24_s12 = sshll.u32 %s4268_s11, 4  ;;  %s39_s10 = int_to_ptr.vmem [resolvable:$true] %s38_s10  ;;  %s4326_s12 = int_to_ptr.vmem [resolvable:$true] %s24_s12 }
   0x4   :  { %s4173_s15 = scalar_lea.hbm %s4468_s3, 16384 }
   0x5   :  { %p4174_p0 = scmp.ne.s32.totalorder %s4468_s3, %s4173_s15  ;;  %p4177_p1 = scmp.lt.u32.totalorder %s4173_s15, %s4468_s3 }
   0x7   :  { %p4179_p2 = pnand %p4177_p1, %p4174_p0 }
   0x9   :  { %4182 = shalt.err (!%p4179_p2)
}
   0xa   :  { %s4183_s20 = scalar_lea.vmem %s39_s10, 16384  ;;  %p4188_p4 = scmp.lt.s32.totalorder %s39_s10, %s39_s10 }
   0xb   :  { %p4184_p3 = scmp.ne.s32.totalorder %s39_s10, %s4183_s20  ;;  %p4189_p5 = scmp.lt.s32.totalorder %s4183_s20, %s4183_s20 }
   0xd   :  { %p4190_p6 = por %p4189_p5, %p4188_p4 }
   0xf   :  { %p4191_p7 = pnand %p4190_p6, %p4184_p3 }
  0x11   :  { %4194 = shalt.err (!%p4191_p7)
}
  0x12   :  { %s4269_s21 = smov 256   ;;  %s4270_s22 = smov 16  }
  0x13   :  { %44 = dma.hbm_to_vmem [thread:$0]  %s4468_s3, 16384, %s39_s10, [#allocation5], %s4269_s21, %s4269_s21, %s4270_s22  }
  0x14   :  { %s4195_s27 = scalar_lea.hbm %s4466_s1, 12288 }
  0x15   :  { %p4196_p8 = scmp.ne.s32.totalorder %s4466_s1, %s4195_s27  ;;  %p4199_p9 = scmp.lt.u32.totalorder %s4195_s27, %s4466_s1 }
  0x17   :  { %p4201_p10 = pnand %p4199_p9, %p4196_p8 }
  0x19   :  { %4204 = shalt.err (!%p4201_p10)
}
  0x1a   :  { %s4205_s13 = scalar_lea.vmem %s4326_s12, 12288  ;;  %p4210_p12 = scmp.lt.s32.totalorder %s4326_s12, %s4326_s12 }
  0x1b   :  { %p4206_p11 = scmp.ne.s32.totalorder %s4326_s12, %s4205_s13  ;;  %p4211_p13 = scmp.lt.s32.totalorder %s4205_s13, %s4205_s13 }
  0x1d   :  { %p4212_p0 = por %p4211_p13, %p4210_p12 }
  0x1f   :  { %p4213_p1 = pnand %p4212_p0, %p4206_p11 }
  0x21   :  { %4216 = shalt.err (!%p4213_p1)
}
  0x22   :  { %30 = dma.hbm_to_vmem [thread:$0]  %s4466_s1, 12288, %s4326_s12, [#allocation3], %s4269_s21, %s4269_s21, %s4270_s22  }
  0x23   :  { %s4271_s14 = smov [#allocation6]   ;;  %s4272_s16 = smov [#allocation7]  }
  0x24   :  { %s52_s15 = sshll.u32 %s4271_s14, 4  ;;  %s66_s17 = sshll.u32 %s4272_s16, 4  ;;  %s53_s15 = int_to_ptr.vmem [resolvable:$true] %s52_s15  ;;  %s4363_s17 = int_to_ptr.vmem [resolvable:$true] %s66_s17 }
  0x25   :  { %s4217_s20 = scalar_lea.hbm %s4470_s5, 16384 }
  0x26   :  { %p4218_p2 = scmp.ne.s32.totalorder %s4470_s5, %s4217_s20  ;;  %p4221_p3 = scmp.lt.u32.totalorder %s4217_s20, %s4470_s5 }
  0x28   :  { %p4223_p4 = pnand %p4221_p3, %p4218_p2 }
  0x2a   :  { %4226 = shalt.err (!%p4223_p4)
}
  0x2b   :  { %s4227_s1 = scalar_lea.vmem %s53_s15, 16384  ;;  %p4232_p6 = scmp.lt.s32.totalorder %s53_s15, %s53_s15 }
  0x2c   :  { %p4228_p5 = scmp.ne.s32.totalorder %s53_s15, %s4227_s1  ;;  %p4233_p7 = scmp.lt.s32.totalorder %s4227_s1, %s4227_s1 }
  0x2e   :  { %p4234_p8 = por %p4233_p7, %p4232_p6 }
  0x30   :  { %p4235_p9 = pnand %p4234_p8, %p4228_p5 }
  0x32   :  { %4238 = shalt.err (!%p4235_p9)
}
  0x33   :  { %58 = dma.hbm_to_vmem [thread:$0]  %s4470_s5, 16384, %s53_s15, [#allocation5], %s4269_s21, %s4269_s21, %s4270_s22  }
  0x34   :  { %s4239_s30 = scalar_lea.hbm %s4472_s7, 4096 }
  0x35   :  { %p4240_p10 = scmp.ne.s32.totalorder %s4472_s7, %s4239_s30  ;;  %p4243_p11 = scmp.lt.u32.totalorder %s4239_s30, %s4472_s7 }
  0x37   :  { %p4245_p12 = pnand %p4243_p11, %p4240_p10 }
  0x39   :  { %4248 = shalt.err (!%p4245_p12)
}
  0x3a   :  { %s4249_s14 = scalar_lea.vmem %s4363_s17, 4096  ;;  %p4254_p0 = scmp.lt.s32.totalorder %s4363_s17, %s4363_s17 }
  0x3b   :  { %p4250_p13 = scmp.ne.s32.totalorder %s4363_s17, %s4249_s14  ;;  %p4255_p1 = scmp.lt.s32.totalorder %s4249_s14, %s4249_s14 }
  0x3d   :  { %p4256_p2 = por %p4255_p1, %p4254_p0 }
  0x3f   :  { %p4257_p3 = pnand %p4256_p2, %p4250_p13 }
  0x41   :  { %4260 = shalt.err (!%p4257_p3)
}
  0x42   :  { %s4273_s5 = smov 64   ;;  %s4274_s21 = smov 4  }
  0x43   :  { %72 = dma.hbm_to_vmem [thread:$0]  %s4472_s7, 4096, %s4363_s17, [#allocation8], %s4273_s5, %s4273_s5, %s4274_s21  }
  0x44   :  { %4261 = dma.done.wait [#allocation3], 12288  }
  0x45   :  { %4262 = vsyncadd [#allocation3], 4294955008 }
  0x46   :  { %4263 = dma.done.wait [#allocation5], 32768  }
  0x47   :  { %4264 = vsyncadd [#allocation5], 4294934528 }
  0x48   :  { %4265 = dma.done.wait [#allocation8], 4096  }
  0x49   :  { %4266 = vsyncadd [#allocation8], 4294963200  ;;  %v3613_v0 = vld [vmem:[#allocation2 + $0x4] ss:$16 sps:$4 sm:$0xff]   ;;  %v3615_v1 = vld [vmem:[#allocation2] ss:$16 sps:$4 sm:$0xff]  }
  0x4a   :  { %692 = vmatprep.subr.bf16.mxu0 %v3613_v0  ;;  %v3616_v2 = vld [vmem:[#allocation2 + $0x24] ss:$16 sps:$4 sm:$0xff]   ;;  %v3618_v3 = vld [vmem:[#allocation2 + $0x20] ss:$16 sps:$4 sm:$0xff]   ;;  %v3637_v8 = vld [vmem:[#allocation2 + $0xc] ss:$16 sps:$4 sm:$0xff]  }
  0x4b   :  { %693 = vmatpush1.bf16.msra.mxu0 %v3615_v1  ;;  %v3619_v4 = vld [vmem:[#allocation2 + $0x44] ss:$16 sps:$4 sm:$0xff]   ;;  %v3621_v5 = vld [vmem:[#allocation2 + $0x40] ss:$16 sps:$4 sm:$0xff]   ;;  %v3639_v9 = vld [vmem:[#allocation2 + $0x8] ss:$16 sps:$4 sm:$0xff]   ;;  %774 = vmatprep.subr.bf16.mxu1 %v3637_v8 }
  0x4c   :  { %694 = vmatprep.subr.bf16.mxu0 %v3616_v2  ;;  %v3622_v6 = vld [vmem:[#allocation2 + $0x64] ss:$16 sps:$4 sm:$0xff]   ;;  %v3624_v7 = vld [vmem:[#allocation2 + $0x60] ss:$16 sps:$4 sm:$0xff]   ;;  %775 = vmatpush1.bf16.msra.mxu1 %v3639_v9  ;;  %v3643_v11 = vld [vmem:[#allocation2 + $0x2c] ss:$16 sps:$4 sm:$0xff]  }
  0x4d   :  { %v3625_v10 = vld [vmem:[#allocation2 + $0x84] ss:$16 sps:$4 sm:$0xff]   ;;  %v3645_v12 = vld [vmem:[#allocation2 + $0x28] ss:$16 sps:$4 sm:$0xff]   ;;  %v3627_v13 = vld [vmem:[#allocation2 + $0x80] ss:$16 sps:$4 sm:$0xff]   ;;  %776 = vmatprep.subr.bf16.mxu1 %v3643_v11 }
  0x4e   :  { %v3628_v14 = vld [vmem:[#allocation2 + $0xa4] ss:$16 sps:$4 sm:$0xff]   ;;  %v3649_v15 = vld [vmem:[#allocation2 + $0x4c] ss:$16 sps:$4 sm:$0xff]   ;;  %v3651_v16 = vld [vmem:[#allocation2 + $0x48] ss:$16 sps:$4 sm:$0xff]  }
  0x4f   :  { %695 = vmatpush1.bf16.msra.mxu0 %v3618_v3  ;;  %v3630_v17 = vld [vmem:[#allocation2 + $0xa0] ss:$16 sps:$4 sm:$0xff]   ;;  %v3655_v18 = vld [vmem:[#allocation2 + $0x6c] ss:$16 sps:$4 sm:$0xff]   ;;  %v3631_v19 = vld [vmem:[#allocation2 + $0xc4] ss:$16 sps:$4 sm:$0xff]  }
  0x50   :  { %696 = vmatprep.subr.bf16.mxu0 %v3619_v4  ;;  %777 = vmatpush1.bf16.msra.mxu1 %v3645_v12  ;;  %v3657_v20 = vld [vmem:[#allocation2 + $0x68] ss:$16 sps:$4 sm:$0xff]   ;;  %v3633_v21 = vld [vmem:[#allocation2 + $0xc0] ss:$16 sps:$4 sm:$0xff]   ;;  %v3661_v22 = vld [vmem:[#allocation2 + $0x8c] ss:$16 sps:$4 sm:$0xff]  }
  0x51   :  { %778 = vmatprep.subr.bf16.mxu1 %v3649_v15  ;;  %v3634_v23 = vld [vmem:[#allocation2 + $0xe4] ss:$16 sps:$4 sm:$0xff]   ;;  %v3663_v24 = vld [vmem:[#allocation2 + $0x88] ss:$16 sps:$4 sm:$0xff]   ;;  %v3636_v25 = vld [vmem:[#allocation2 + $0xe0] ss:$16 sps:$4 sm:$0xff]  }
  0x52   :  { %v3667_v26 = vld [vmem:[#allocation2 + $0xac] ss:$16 sps:$4 sm:$0xff]   ;;  %v3640_v27 = vld [vmem:[#allocation2 + $0x104] ss:$16 sps:$4 sm:$0xff]   ;;  %v3669_v28 = vld [vmem:[#allocation2 + $0xa8] ss:$16 sps:$4 sm:$0xff]  }
  0x53   :  { %697 = vmatpush1.bf16.msra.mxu0 %v3621_v5  ;;  %v3642_v29 = vld [vmem:[#allocation2 + $0x100] ss:$16 sps:$4 sm:$0xff]   ;;  %v3673_v30 = vld [vmem:[#allocation2 + $0xcc] ss:$16 sps:$4 sm:$0xff]   ;;  %v3646_v31 = vld [vmem:[#allocation2 + $0x124] ss:$16 sps:$4 sm:$0xff]  }
  0x54   :  { %698 = vmatprep.subr.bf16.mxu0 %v3622_v6  ;;  %779 = vmatpush1.bf16.msra.mxu1 %v3651_v16  ;;  %v89_v32 = vld [vmem:[%s4465_s0 + $0x8] sm:$0xff]  ;;  %v3648_v33 = vld [vmem:[#allocation2 + $0x120] ss:$16 sps:$4 sm:$0xff]   ;;  %v3652_v37 = vld [vmem:[#allocation2 + $0x144] ss:$16 sps:$4 sm:$0xff]   ;;  %v4275_v8 = vmov 0  }
  0x55   :  { %780 = vmatprep.subr.bf16.mxu1 %v3655_v18  ;;  %v3675_v34 = vld [vmem:[#allocation2 + $0xc8] ss:$16 sps:$4 sm:$0xff]   ;;  %v92_v35 = vpack.c.bf16 %v89_v32, %v89_v32  ;;  %v3679_v36 = vld [vmem:[#allocation2 + $0xec] ss:$16 sps:$4 sm:$0xff]   ;;  %v3654_v38 = vld [vmem:[#allocation2 + $0x140] ss:$16 sps:$4 sm:$0xff]  }
  0x56   :  { %v3681_v39 = vld [vmem:[#allocation2 + $0xe8] ss:$16 sps:$4 sm:$0xff]   ;;  %v3685_v40 = vld [vmem:[#allocation2 + $0x10c] ss:$16 sps:$4 sm:$0xff]   ;;  %v3658_v41 = vld [vmem:[#allocation2 + $0x164] ss:$16 sps:$4 sm:$0xff]  }
  0x57   :  { %699 = vmatpush1.bf16.msra.mxu0 %v3624_v7  ;;  %724 = vmatprep.mubr.bf16.mxu0 %v92_v35  ;;  %v3660_v42 = vld [vmem:[#allocation2 + $0x160] ss:$16 sps:$4 sm:$0xff]   ;;  %v3687_v43 = vld [vmem:[#allocation2 + $0x108] ss:$16 sps:$4 sm:$0xff]   ;;  %v3691_v44 = vld [vmem:[#allocation2 + $0x12c] ss:$16 sps:$4 sm:$0xff]  }
  0x58   :  { %700 = vmatprep.subr.bf16.mxu0 %v3625_v10  ;;  %781 = vmatpush1.bf16.msra.mxu1 %v3657_v20  ;;  %v3664_v45 = vld [vmem:[#allocation2 + $0x184] ss:$16 sps:$4 sm:$0xff]   ;;  %v3666_v46 = vld [vmem:[#allocation2 + $0x180] ss:$16 sps:$4 sm:$0xff]   ;;  %v3693_v47 = vld [vmem:[#allocation2 + $0x128] ss:$16 sps:$4 sm:$0xff]  }
  0x59   :  { %782 = vmatprep.subr.bf16.mxu1 %v3661_v22  ;;  %806 = vmatprep.mubr.bf16.mxu1 %v92_v35  ;;  %v3697_v48 = vld [vmem:[#allocation2 + $0x14c] ss:$16 sps:$4 sm:$0xff]   ;;  %v3670_v49 = vld [vmem:[#allocation2 + $0x1a4] ss:$16 sps:$4 sm:$0xff]   ;;  %v3672_v50 = vld [vmem:[#allocation2 + $0x1a0] ss:$16 sps:$4 sm:$0xff]  }
  0x5a   :  { %v3699_v51 = vld [vmem:[#allocation2 + $0x148] ss:$16 sps:$4 sm:$0xff]   ;;  %v3703_v52 = vld [vmem:[#allocation2 + $0x16c] ss:$16 sps:$4 sm:$0xff]   ;;  %v3676_v53 = vld [vmem:[#allocation2 + $0x1c4] ss:$16 sps:$4 sm:$0xff]  }
  0x5b   :  { %701 = vmatpush1.bf16.msra.mxu0 %v3627_v13  ;;  %v3705_v54 = vld [vmem:[#allocation2 + $0x168] ss:$16 sps:$4 sm:$0xff]   ;;  %v3678_v55 = vld [vmem:[#allocation2 + $0x1c0] ss:$16 sps:$4 sm:$0xff]   ;;  %v3709_v56 = vld [vmem:[#allocation2 + $0x18c] ss:$16 sps:$4 sm:$0xff]  }
  0x5c   :  { %702 = vmatprep.subr.bf16.mxu0 %v3628_v14  ;;  %783 = vmatpush1.bf16.msra.mxu1 %v3663_v24  ;;  %v3682_v57 = vld [vmem:[#allocation2 + $0x1e4] ss:$16 sps:$4 sm:$0xff]   ;;  %v3684_v58 = vld [vmem:[#allocation2 + $0x1e0] ss:$16 sps:$4 sm:$0xff]   ;;  %v3711_v59 = vld [vmem:[#allocation2 + $0x188] ss:$16 sps:$4 sm:$0xff]  }
  0x5d   :  { %784 = vmatprep.subr.bf16.mxu1 %v3667_v26  ;;  %v88_v60 = vld [vmem:[%s4465_s0] sm:$0xff]  ;;  %v3715_v61 = vld [vmem:[#allocation2 + $0x1ac] ss:$16 sps:$4 sm:$0xff]   ;;  %v3717_v0 = vld [vmem:[#allocation2 + $0x1a8] ss:$16 sps:$4 sm:$0xff]  }
  0x5e   :  { %v3690_v62 = vld [vmem:[#allocation2 + $0x204] ss:$16 sps:$4 sm:$0xff]   ;;  %v91_v63 = vpack.c.bf16 %v88_v60, %v88_v60  ;;  %v3688_v1 = vld [vmem:[#allocation2 + $0x200] ss:$16 sps:$4 sm:$0xff]   ;;  %v3721_v2 = vld [vmem:[#allocation2 + $0x1cc] ss:$16 sps:$4 sm:$0xff]  }
  0x5f   :  { %703 = vmatpush1.bf16.msra.mxu0 %v3630_v17  ;;  %v3696_v3 = vld [vmem:[#allocation2 + $0x224] ss:$16 sps:$4 sm:$0xff]   ;;  %v3723_v4 = vld [vmem:[#allocation2 + $0x1c8] ss:$16 sps:$4 sm:$0xff]   ;;  %v3694_v5 = vld [vmem:[#allocation2 + $0x220] ss:$16 sps:$4 sm:$0xff]  }
  0x60   :  { %704 = vmatprep.subr.bf16.mxu0 %v3631_v19  ;;  %785 = vmatpush1.bf16.msra.mxu1 %v3669_v28  ;;  %v3727_v6 = vld [vmem:[#allocation2 + $0x1ec] ss:$16 sps:$4 sm:$0xff]   ;;  %v3702_v7 = vld [vmem:[#allocation2 + $0x244] ss:$16 sps:$4 sm:$0xff]   ;;  %v3729_v9 = vld [vmem:[#allocation2 + $0x1e8] ss:$16 sps:$4 sm:$0xff]  }
  0x61   :  { %786 = vmatprep.subr.bf16.mxu1 %v3673_v30  ;;  %v3700_v10 = vld [vmem:[#allocation2 + $0x240] ss:$16 sps:$4 sm:$0xff]   ;;  %v3735_v11 = vld [vmem:[#allocation2 + $0x20c] ss:$16 sps:$4 sm:$0xff]   ;;  %v3708_v12 = vld [vmem:[#allocation2 + $0x264] ss:$16 sps:$4 sm:$0xff]  }
  0x62   :  { %v3733_v13 = vld [vmem:[#allocation2 + $0x208] ss:$16 sps:$4 sm:$0xff]   ;;  %v3706_v14 = vld [vmem:[#allocation2 + $0x260] ss:$16 sps:$4 sm:$0xff]   ;;  %v3738_v15 = vld [vmem:[#allocation2 + $0x22c] ss:$16 sps:$4 sm:$0xff]  }
  0x63   :  { %705 = vmatpush1.bf16.msra.mxu0 %v3633_v21  ;;  %v3714_v16 = vld [vmem:[#allocation2 + $0x284] ss:$16 sps:$4 sm:$0xff]   ;;  %v3736_v17 = vld [vmem:[#allocation2 + $0x228] ss:$16 sps:$4 sm:$0xff]   ;;  %v3712_v18 = vld [vmem:[#allocation2 + $0x280] ss:$16 sps:$4 sm:$0xff]  }
  0x64   :  { %706 = vmatprep.subr.bf16.mxu0 %v3634_v23  ;;  %787 = vmatpush1.bf16.msra.mxu1 %v3675_v34  ;;  %v3741_v19 = vld [vmem:[#allocation2 + $0x24c] ss:$16 sps:$4 sm:$0xff]   ;;  %v3720_v20 = vld [vmem:[#allocation2 + $0x2a4] ss:$16 sps:$4 sm:$0xff]   ;;  %v3739_v21 = vld [vmem:[#allocation2 + $0x248] ss:$16 sps:$4 sm:$0xff]  }
  0x65   :  { %788 = vmatprep.subr.bf16.mxu1 %v3679_v36  ;;  %v3718_v22 = vld [vmem:[#allocation2 + $0x2a0] ss:$16 sps:$4 sm:$0xff]   ;;  %v3744_v23 = vld [vmem:[#allocation2 + $0x26c] ss:$16 sps:$4 sm:$0xff]   ;;  %v3726_v24 = vld [vmem:[#allocation2 + $0x2c4] ss:$16 sps:$4 sm:$0xff]  }
  0x66   :  { %v3724_v26 = vld [vmem:[#allocation2 + $0x2c0] ss:$16 sps:$4 sm:$0xff]   ;;  %v3732_v28 = vld [vmem:[#allocation2 + $0x2e4] ss:$16 sps:$4 sm:$0xff]   ;;  %v3745_v30 = vld [vmem:[#allocation2 + $0x288] ss:$16 sps:$4 sm:$0xff]  }
  0x67   :  { %707 = vmatpush1.bf16.msra.mxu0 %v3636_v25  ;;  %v3742_v25 = vld [vmem:[#allocation2 + $0x268] ss:$16 sps:$4 sm:$0xff]   ;;  %v3750_v32 = vld [vmem:[#allocation2 + $0x2ac] ss:$16 sps:$4 sm:$0xff]  }
  0x68   :  { %708 = vmatprep.subr.bf16.mxu0 %v3640_v27  ;;  %789 = vmatpush1.bf16.msra.mxu1 %v3681_v39  ;;  %v3747_v27 = vld [vmem:[#allocation2 + $0x28c] ss:$16 sps:$4 sm:$0xff]   ;;  %v3748_v35 = vld [vmem:[#allocation2 + $0x2a8] ss:$16 sps:$4 sm:$0xff]  }
  0x69   :  { %790 = vmatprep.subr.bf16.mxu1 %v3685_v40  ;;  %v3753_v36 = vld [vmem:[#allocation2 + $0x2cc] ss:$16 sps:$4 sm:$0xff]   ;;  %v3751_v39 = vld [vmem:[#allocation2 + $0x2c8] ss:$16 sps:$4 sm:$0xff]  }
  0x6a   :  { %v3756_v40 = vld [vmem:[#allocation2 + $0x2ec] ss:$16 sps:$4 sm:$0xff]  }
  0x6b   :  { %709 = vmatpush1.bf16.msra.mxu0 %v3642_v29  ;;  %v3730_v29 = vld [vmem:[#allocation2 + $0x2e0] ss:$16 sps:$4 sm:$0xff]   ;;  %v3786_v60 = vld [vmem:[#allocation4 + $0x8c] ss:$16 sps:$4 sm:$0xff]  }
  0x6c   :  { %710 = vmatprep.subr.bf16.mxu0 %v3646_v31  ;;  %791 = vmatpush1.bf16.msra.mxu1 %v3687_v43  ;;  %v90_v31 = vld [vmem:[%s4465_s0 + $0x10] sm:$0xff] }
  0x6d   :  { %792 = vmatprep.subr.bf16.mxu1 %v3691_v44  ;;  %v93_v34 = vpack.c.bf16 %v90_v31, %v90_v31  ;;  %v3771_v43 = vld [vmem:[#allocation4 + $0x44] ss:$16 sps:$4 sm:$0xff]   ;;  %v3762_v44 = vld [vmem:[#allocation4 + $0xc] ss:$16 sps:$4 sm:$0xff]  }
  0x6e   :  { %v3843_v31 = vld [vmem:[#allocation4 + $0x1c4] ss:$16 sps:$4 sm:$0xff]  }
  0x6f   :  { %711 = vmatpush1.bf16.msra.mxu0 %v3648_v33  ;;  %v3759_v33 = vld [vmem:[#allocation4 + $0x4] ss:$16 sps:$4 sm:$0xff]  }
  0x70   :  { %712 = vmatprep.subr.bf16.mxu0 %v3652_v37  ;;  %793 = vmatpush1.bf16.msra.mxu1 %v3693_v47  ;;  %v3757_v37 = vld [vmem:[#allocation4] ss:$16 sps:$4 sm:$0xff]   ;;  %v3760_v47 = vld [vmem:[#allocation4 + $0x8] ss:$16 sps:$4 sm:$0xff]  }
  0x71   :  { %794 = vmatprep.subr.bf16.mxu1 %v3697_v48  ;;  %v3768_v48 = vld [vmem:[#allocation4 + $0x2c] ss:$16 sps:$4 sm:$0xff]  }
  0x73   :  { %713 = vmatpush1.bf16.msra.mxu0 %v3654_v38  ;;  %v3765_v38 = vld [vmem:[#allocation4 + $0x24] ss:$16 sps:$4 sm:$0xff]  }
  0x74   :  { %714 = vmatprep.subr.bf16.mxu0 %v3658_v41  ;;  %795 = vmatpush1.bf16.msra.mxu1 %v3699_v51  ;;  %v3763_v41 = vld [vmem:[#allocation4 + $0x20] ss:$16 sps:$4 sm:$0xff]   ;;  %v3766_v51 = vld [vmem:[#allocation4 + $0x28] ss:$16 sps:$4 sm:$0xff]  }
  0x75   :  { %796 = vmatprep.subr.bf16.mxu1 %v3703_v52  ;;  %v3774_v52 = vld [vmem:[#allocation4 + $0x4c] ss:$16 sps:$4 sm:$0xff]  }
  0x77   :  { %715 = vmatpush1.bf16.msra.mxu0 %v3660_v42  ;;  %v3754_v42 = vld [vmem:[#allocation2 + $0x2e8] ss:$16 sps:$4 sm:$0xff]  }
  0x78   :  { %716 = vmatprep.subr.bf16.mxu0 %v3664_v45  ;;  %797 = vmatpush1.bf16.msra.mxu1 %v3705_v54  ;;  %v3769_v45 = vld [vmem:[#allocation4 + $0x40] ss:$16 sps:$4 sm:$0xff]   ;;  %v3789_v54 = vld [vmem:[#allocation4 + $0xa4] ss:$16 sps:$4 sm:$0xff]  }
  0x79   :  { %798 = vmatprep.subr.bf16.mxu1 %v3709_v56  ;;  %v3780_v56 = vld [vmem:[#allocation4 + $0x6c] ss:$16 sps:$4 sm:$0xff]  }
  0x7b   :  { %717 = vmatpush1.bf16.msra.mxu0 %v3666_v46  ;;  %v3777_v46 = vld [vmem:[#allocation4 + $0x64] ss:$16 sps:$4 sm:$0xff]  }
  0x7c   :  { %718 = vmatprep.subr.bf16.mxu0 %v3670_v49  ;;  %799 = vmatpush1.bf16.msra.mxu1 %v3711_v59  ;;  %v3775_v49 = vld [vmem:[#allocation4 + $0x60] ss:$16 sps:$4 sm:$0xff]   ;;  %v3778_v59 = vld [vmem:[#allocation4 + $0x68] ss:$16 sps:$4 sm:$0xff]  }
  0x7d   :  { %800 = vmatprep.subr.bf16.mxu1 %v3715_v61  ;;  %v3793_v61 = vld [vmem:[#allocation4 + $0xc0] ss:$16 sps:$4 sm:$0xff]  }
  0x7f   :  { %719 = vmatpush1.bf16.msra.mxu0 %v3672_v50  ;;  %v3783_v50 = vld [vmem:[#allocation4 + $0x84] ss:$16 sps:$4 sm:$0xff]  }
  0x80   :  { %720 = vmatprep.subr.bf16.mxu0 %v3676_v53  ;;  %801 = vmatpush1.bf16.msra.mxu1 %v3717_v0  ;;  %v3781_v53 = vld [vmem:[#allocation4 + $0x80] ss:$16 sps:$4 sm:$0xff]   ;;  %v3792_v0 = vld [vmem:[#allocation4 + $0xac] ss:$16 sps:$4 sm:$0xff]  }
  0x81   :  { %802 = vmatprep.subr.bf16.mxu1 %v3721_v2  ;;  %v3807_v2 = vld [vmem:[#allocation4 + $0x104] ss:$16 sps:$4 sm:$0xff]  }
  0x83   :  { %721 = vmatpush1.bf16.msra.mxu0 %v3678_v55  ;;  %v3772_v55 = vld [vmem:[#allocation4 + $0x48] ss:$16 sps:$4 sm:$0xff]  }
  0x84   :  { %722 = vmatprep.subr.bf16.mxu0 %v3682_v57  ;;  %803 = vmatpush1.bf16.msra.mxu1 %v3723_v4  ;;  %v3787_v57 = vld [vmem:[#allocation4 + $0xa0] ss:$16 sps:$4 sm:$0xff]   ;;  %v3798_v4 = vld [vmem:[#allocation4 + $0xcc] ss:$16 sps:$4 sm:$0xff]  }
  0x85   :  { %804 = vmatprep.subr.bf16.mxu1 %v3727_v6  ;;  %v3813_v6 = vld [vmem:[#allocation4 + $0x124] ss:$16 sps:$4 sm:$0xff]  }
  0x87   :  { %723 = vmatpush1.bf16.msra.mxu0 %v3684_v58  ;;  %v3795_v58 = vld [vmem:[#allocation4 + $0xc4] ss:$16 sps:$4 sm:$0xff]  }
  0x88   :  { %733 = vmatprep.subr.bf16.mxu0 %v3690_v62  ;;  %805 = vmatpush1.bf16.msra.mxu1 %v3729_v9  ;;  %v3801_v62 = vld [vmem:[#allocation4 + $0xe4] ss:$16 sps:$4 sm:$0xff]   ;;  %v3811_v9 = vld [vmem:[#allocation4 + $0x120] ss:$16 sps:$4 sm:$0xff]  }
  0x89   :  { %815 = vmatprep.subr.bf16.mxu1 %v3735_v11  ;;  %v3802_v11 = vld [vmem:[#allocation4 + $0xe8] ss:$16 sps:$4 sm:$0xff]  }
  0x8a   :  { %725 = vmatmul.mubr.bf16.vlgmr.msra.gmra.mrb[0].mxu0 %v91_v63 }
  0x8b   :  { %734 = vmatpush1.bf16.msra.mxu0 %v3688_v1  ;;  %765 = vmatprep.mubr.bf16.mxu0 %v4275_v8  ;;  %v3799_v1 = vld [vmem:[#allocation4 + $0xe0] ss:$16 sps:$4 sm:$0xff]  }
  0x8c   :  { %735 = vmatprep.subr.bf16.mxu0 %v3696_v3  ;;  %807 = vmatmul.mubr.bf16.vlgmr.msra.gmra.mrb[0].mxu1 %v91_v63  ;;  %v3784_v63 = vld [vmem:[#allocation4 + $0x88] ss:$16 sps:$4 sm:$0xff]  }
  0x8d   :  { %816 = vmatpush1.bf16.msra.mxu1 %v3733_v13  ;;  %847 = vmatprep.mubr.bf16.mxu1 %v4275_v8  ;;  %v3790_v3 = vld [vmem:[#allocation4 + $0xa8] ss:$16 sps:$4 sm:$0xff]   ;;  %v3804_v8 = vld [vmem:[#allocation4 + $0xec] ss:$16 sps:$4 sm:$0xff]   ;;  %v3817_v13 = vld [vmem:[#allocation4 + $0x140] ss:$16 sps:$4 sm:$0xff]  }
  0x8e   :  { %817 = vmatprep.subr.bf16.mxu1 %v3738_v15  ;;  %v3808_v15 = vld [vmem:[#allocation4 + $0x108] ss:$16 sps:$4 sm:$0xff]  }
  0x8f   :  { %736 = vmatpush1.bf16.msra.mxu0 %v3694_v5  ;;  %v3805_v5 = vld [vmem:[#allocation4 + $0x100] ss:$16 sps:$4 sm:$0xff]  }
  0x90   :  { %737 = vmatprep.subr.bf16.mxu0 %v3702_v7  ;;  %v3796_v7 = vld [vmem:[#allocation4 + $0xc8] ss:$16 sps:$4 sm:$0xff]  }
  0x91   :  { %818 = vmatpush1.bf16.msra.mxu1 %v3736_v17  ;;  %v3823_v17 = vld [vmem:[#allocation4 + $0x160] ss:$16 sps:$4 sm:$0xff]  }
  0x92   :  { %819 = vmatprep.subr.bf16.mxu1 %v3741_v19  ;;  %v3814_v19 = vld [vmem:[#allocation4 + $0x128] ss:$16 sps:$4 sm:$0xff]  }
  0x93   :  { %738 = vmatpush1.bf16.msra.mxu0 %v3700_v10  ;;  %v3819_v10 = vld [vmem:[#allocation4 + $0x144] ss:$16 sps:$4 sm:$0xff]  }
  0x94   :  { %739 = vmatprep.subr.bf16.mxu0 %v3708_v12  ;;  %v3810_v12 = vld [vmem:[#allocation4 + $0x10c] ss:$16 sps:$4 sm:$0xff]  }
  0x95   :  { %820 = vmatpush1.bf16.msra.mxu1 %v3739_v21  ;;  %v3829_v21 = vld [vmem:[#allocation4 + $0x180] ss:$16 sps:$4 sm:$0xff]  }
  0x96   :  { %821 = vmatprep.subr.bf16.mxu1 %v3744_v23  ;;  %v3820_v23 = vld [vmem:[#allocation4 + $0x148] ss:$16 sps:$4 sm:$0xff]  }
  0x97   :  { %740 = vmatpush1.bf16.msra.mxu0 %v3706_v14  ;;  %v3825_v14 = vld [vmem:[#allocation4 + $0x164] ss:$16 sps:$4 sm:$0xff]  }
  0x98   :  { %741 = vmatprep.subr.bf16.mxu0 %v3714_v16  ;;  %v3816_v16 = vld [vmem:[#allocation4 + $0x12c] ss:$16 sps:$4 sm:$0xff]  }
  0x99   :  { %822 = vmatpush1.bf16.msra.mxu1 %v3742_v25  ;;  %v3835_v25 = vld [vmem:[#allocation4 + $0x1a0] ss:$16 sps:$4 sm:$0xff]  }
  0x9a   :  { %823 = vmatprep.subr.bf16.mxu1 %v3747_v27  ;;  %v3834_v27 = vld [vmem:[#allocation4 + $0x18c] ss:$16 sps:$4 sm:$0xff]  }
  0x9b   :  { %742 = vmatpush1.bf16.msra.mxu0 %v3712_v18  ;;  %v3831_v18 = vld [vmem:[#allocation4 + $0x184] ss:$16 sps:$4 sm:$0xff]  }
  0x9c   :  { %743 = vmatprep.subr.bf16.mxu0 %v3720_v20  ;;  %v3822_v20 = vld [vmem:[#allocation4 + $0x14c] ss:$16 sps:$4 sm:$0xff]  }
  0x9d   :  { %824 = vmatpush1.bf16.msra.mxu1 %v3745_v30  ;;  %v3838_v30 = vld [vmem:[#allocation4 + $0x1a8] ss:$16 sps:$4 sm:$0xff]  }
  0x9e   :  { %825 = vmatprep.subr.bf16.mxu1 %v3750_v32  ;;  %v3846_v32 = vld [vmem:[#allocation4 + $0x1cc] ss:$16 sps:$4 sm:$0xff]  }
  0x9f   :  { %744 = vmatpush1.bf16.msra.mxu0 %v3718_v22  ;;  %v3837_v22 = vld [vmem:[#allocation4 + $0x1a4] ss:$16 sps:$4 sm:$0xff]  }
  0xa0   :  { %745 = vmatprep.subr.bf16.mxu0 %v3726_v24  ;;  %v3828_v24 = vld [vmem:[#allocation4 + $0x16c] ss:$16 sps:$4 sm:$0xff]  }
  0xa1   :  { %826 = vmatpush1.bf16.msra.mxu1 %v3748_v35  ;;  %v3849_v35 = vld [vmem:[#allocation4 + $0x1e4] ss:$16 sps:$4 sm:$0xff]  }
  0xa2   :  { %827 = vmatprep.subr.bf16.mxu1 %v3753_v36  ;;  %v3852_v36 = vld [vmem:[#allocation4 + $0x1ec] ss:$16 sps:$4 sm:$0xff]  }
  0xa3   :  { %746 = vmatpush1.bf16.msra.mxu0 %v3724_v26  ;;  %v3826_v26 = vld [vmem:[#allocation4 + $0x168] ss:$16 sps:$4 sm:$0xff]  }
  0xa4   :  { %747 = vmatprep.subr.bf16.mxu0 %v3732_v28  ;;  %v3832_v28 = vld [vmem:[#allocation4 + $0x188] ss:$16 sps:$4 sm:$0xff]  }
  0xa5   :  { %828 = vmatpush1.bf16.msra.mxu1 %v3751_v39  ;;  %v3855_v39 = vld [vmem:[#allocation4 + $0x204] ss:$16 sps:$4 sm:$0xff]  }
  0xa6   :  { %829 = vmatprep.subr.bf16.mxu1 %v3756_v40  ;;  %v3858_v40 = vld [vmem:[#allocation4 + $0x20c] ss:$16 sps:$4 sm:$0xff]  }
  0xa7   :  { %748 = vmatpush1.bf16.msra.mxu0 %v3730_v29  ;;  %v3840_v29 = vld [vmem:[#allocation4 + $0x1ac] ss:$16 sps:$4 sm:$0xff]  }
  0xa8   :  { %1654 = vmatprep.subr.bf16.mxu0 %v3759_v33  ;;  %v3841_v33 = vld [vmem:[#allocation4 + $0x1c0] ss:$16 sps:$4 sm:$0xff]  }
  0xa9   :  { %830 = vmatpush1.bf16.msra.mxu1 %v3754_v42 }
  0xaa   :  { %766 = vmatmul.mubr.bf16.vlgmr.msra.gmra.mrb[0].mxu0 %v93_v34  ;;  %1736 = vmatprep.subr.bf16.mxu1 %v3762_v44  ;;  %v4414_v44 = vld [vmem:[%s4467_s2] sm:$0xf] }
  0xab   :  { %1655 = vmatpush1.bf16.msra.mxu0 %v3757_v37  ;;  %v3847_v37 = vld [vmem:[#allocation4 + $0x1e0] ss:$16 sps:$4 sm:$0xff]  }
  0xac   :  { %1656 = vmatprep.subr.bf16.mxu0 %v3765_v38  ;;  %848 = vmatmul.mubr.bf16.vlgmr.msra.gmra.mrb[0].mxu1 %v93_v34  ;;  %v3844_v34 = vld [vmem:[#allocation4 + $0x1c8] ss:$16 sps:$4 sm:$0xff]  }
  0xad   :  { %1737 = vmatpush1.bf16.msra.mxu1 %v3760_v47  ;;  %v3850_v38 = vld [vmem:[#allocation4 + $0x1e8] ss:$16 sps:$4 sm:$0xff]  }
  0xae   :  { %1738 = vmatprep.subr.bf16.mxu1 %v3768_v48 }
  0xaf   :  { %1657 = vmatpush1.bf16.msra.mxu0 %v3763_v41  ;;  %v192_v41 = vlaneseq }
  0xb0   :  { %1658 = vmatprep.subr.bf16.mxu0 %v3771_v43 }
  0xb1   :  { %1739 = vmatpush1.bf16.msra.mxu1 %v3766_v51  ;;  %v4406_v42 = vshrl.u32 %v192_v41, 7  ;;  %v3915_v41 = vld [vmem:[#allocation4 + $0x344] ss:$16 sps:$4 sm:$0xff]  }
  0xb2   :  { %1740 = vmatprep.subr.bf16.mxu1 %v3774_v52 }
  0xb3   :  { %1659 = vmatpush1.bf16.msra.mxu0 %v3769_v45  ;;  %v4409_v43 = vsub.s32 0, %v4406_v42  ;;  %v4417_v45 = vsub.s32 1, %v4406_v42 }
  0xb4   :  { %1660 = vmatprep.subr.bf16.mxu0 %v3777_v46 }
  0xb5   :  { %1741 = vmatpush1.bf16.msra.mxu1 %v3772_v55  ;;  %v195_v46 = vrot.slane %v4414_v44, %v4409_v43  ;;  %v199_v47 = vrot.slane %v4414_v44, %v4417_v45 }
  0xb6   :  { %1742 = vmatprep.subr.bf16.mxu1 %v3780_v56  ;;  %v4424_v56 = vsub.s32 3, %v4406_v42 }
  0xb7   :  { %1661 = vmatpush1.bf16.msra.mxu0 %v3775_v49 }
  0xb8   :  { %1662 = vmatprep.subr.bf16.mxu0 %v3783_v50 }
  0xb9   :  { %1743 = vmatpush1.bf16.msra.mxu1 %v3778_v59  ;;  %v3856_v59 = vld [vmem:[#allocation4 + $0x208] ss:$16 sps:$4 sm:$0xff]  }
  0xba   :  { %1744 = vmatprep.subr.bf16.mxu1 %v3786_v60 }
  0xbb   :  { %1663 = vmatpush1.bf16.msra.mxu0 %v3781_v53 }
  0xbc   :  { %1664 = vmatprep.subr.bf16.mxu0 %v3789_v54 }
  0xbd   :  { %1745 = vmatpush1.bf16.msra.mxu1 %v3784_v63  ;;  %v207_v63 = vrot.slane %v4414_v44, %v4424_v56 }
  0xbe   :  { %1746 = vmatprep.subr.bf16.mxu1 %v3792_v0  ;;  %v3859_v0 = vld [vmem:[#allocation4 + $0x220] ss:$16 sps:$4 sm:$0xff]  }
  0xbf   :  { %1665 = vmatpush1.bf16.msra.mxu0 %v3787_v57 }
  0xc0   :  { %1666 = vmatprep.subr.bf16.mxu0 %v3795_v58  ;;  %v3853_v58 = vld [vmem:[#allocation4 + $0x200] ss:$16 sps:$4 sm:$0xff]  }
  0xc1   :  { %1747 = vmatpush1.bf16.msra.mxu1 %v3790_v3  ;;  %v3870_v3 = vld [vmem:[#allocation4 + $0x24c] ss:$16 sps:$4 sm:$0xff]  }
  0xc2   :  { %1748 = vmatprep.subr.bf16.mxu1 %v3798_v4 }
  0xc3   :  { %1667 = vmatpush1.bf16.msra.mxu0 %v3793_v61  ;;  %v3861_v61 = vld [vmem:[#allocation4 + $0x224] ss:$16 sps:$4 sm:$0xff]  }
  0xc4   :  { %1668 = vmatprep.subr.bf16.mxu0 %v3801_v62  ;;  %v3864_v62 = vld [vmem:[#allocation4 + $0x22c] ss:$16 sps:$4 sm:$0xff]  }
  0xc5   :  { %1749 = vmatpush1.bf16.msra.mxu1 %v3796_v7 }
  0xc6   :  { %1750 = vmatprep.subr.bf16.mxu1 %v3804_v8  ;;  %v3865_v8 = vld [vmem:[#allocation4 + $0x240] ss:$16 sps:$4 sm:$0xff]  }
  0xc7   :  { %1669 = vmatpush1.bf16.msra.mxu0 %v3799_v1  ;;  %v3862_v1 = vld [vmem:[#allocation4 + $0x228] ss:$16 sps:$4 sm:$0xff]  }
  0xc8   :  { %1670 = vmatprep.subr.bf16.mxu0 %v3807_v2  ;;  %v3867_v2 = vld [vmem:[#allocation4 + $0x244] ss:$16 sps:$4 sm:$0xff]  }
  0xc9   :  { %1751 = vmatpush1.bf16.msra.mxu1 %v3802_v11  ;;  %v3873_v11 = vld [vmem:[#allocation4 + $0x264] ss:$16 sps:$4 sm:$0xff]  }
  0xca   :  { %1752 = vmatprep.subr.bf16.mxu1 %v3810_v12  ;;  %v3876_v12 = vld [vmem:[#allocation4 + $0x26c] ss:$16 sps:$4 sm:$0xff]  }
  0xcb   :  { %1671 = vmatpush1.bf16.msra.mxu0 %v3805_v5 }
  0xcc   :  { %1672 = vmatprep.subr.bf16.mxu0 %v3813_v6 }
  0xcd   :  { %1753 = vmatpush1.bf16.msra.mxu1 %v3808_v15  ;;  %v3871_v15 = vld [vmem:[#allocation4 + $0x260] ss:$16 sps:$4 sm:$0xff]  }
  0xce   :  { %1754 = vmatprep.subr.bf16.mxu1 %v3816_v16  ;;  %v3874_v16 = vld [vmem:[#allocation4 + $0x268] ss:$16 sps:$4 sm:$0xff]  }
  0xcf   :  { %1673 = vmatpush1.bf16.msra.mxu0 %v3811_v9  ;;  %v3868_v9 = vld [vmem:[#allocation4 + $0x248] ss:$16 sps:$4 sm:$0xff]  }
  0xd0   :  { %1674 = vmatprep.subr.bf16.mxu0 %v3819_v10 }
  0xd1   :  { %1755 = vmatpush1.bf16.msra.mxu1 %v3814_v19  ;;  %v3877_v19 = vld [vmem:[#allocation4 + $0x280] ss:$16 sps:$4 sm:$0xff]  }
  0xd2   :  { %1756 = vmatprep.subr.bf16.mxu1 %v3822_v20  ;;  %v3880_v20 = vld [vmem:[#allocation4 + $0x288] ss:$16 sps:$4 sm:$0xff]  }
  0xd3   :  { %1675 = vmatpush1.bf16.msra.mxu0 %v3817_v13 }
  0xd4   :  { %1676 = vmatprep.subr.bf16.mxu0 %v3825_v14 }
  0xd5   :  { %1757 = vmatpush1.bf16.msra.mxu1 %v3820_v23  ;;  %v3883_v23 = vld [vmem:[#allocation4 + $0x2a0] ss:$16 sps:$4 sm:$0xff]  }
  0xd6   :  { %1758 = vmatprep.subr.bf16.mxu1 %v3828_v24  ;;  %v3886_v24 = vld [vmem:[#allocation4 + $0x2a8] ss:$16 sps:$4 sm:$0xff]  }
  0xd7   :  { %1677 = vmatpush1.bf16.msra.mxu0 %v3823_v17  ;;  %v3879_v17 = vld [vmem:[#allocation4 + $0x284] ss:$16 sps:$4 sm:$0xff]  }
  0xd8   :  { %1678 = vmatprep.subr.bf16.mxu0 %v3831_v18  ;;  %v3882_v18 = vld [vmem:[#allocation4 + $0x28c] ss:$16 sps:$4 sm:$0xff]  }
  0xd9   :  { %1759 = vmatpush1.bf16.msra.mxu1 %v3826_v26  ;;  %v3894_v26 = vld [vmem:[#allocation4 + $0x2cc] ss:$16 sps:$4 sm:$0xff]  }
  0xda   :  { %1760 = vmatprep.subr.bf16.mxu1 %v3834_v27  ;;  %v3889_v27 = vld [vmem:[#allocation4 + $0x2c0] ss:$16 sps:$4 sm:$0xff]  }
  0xdb   :  { %1679 = vmatpush1.bf16.msra.mxu0 %v3829_v21  ;;  %v3885_v21 = vld [vmem:[#allocation4 + $0x2a4] ss:$16 sps:$4 sm:$0xff]  }
  0xdc   :  { %1680 = vmatprep.subr.bf16.mxu0 %v3837_v22  ;;  %v3888_v22 = vld [vmem:[#allocation4 + $0x2ac] ss:$16 sps:$4 sm:$0xff]  }
  0xdd   :  { %1761 = vmatpush1.bf16.msra.mxu1 %v3832_v28  ;;  %v3892_v28 = vld [vmem:[#allocation4 + $0x2c8] ss:$16 sps:$4 sm:$0xff]  }
  0xde   :  { %1762 = vmatprep.subr.bf16.mxu1 %v3840_v29  ;;  %v3897_v29 = vld [vmem:[#allocation4 + $0x2e4] ss:$16 sps:$4 sm:$0xff]  }
  0xdf   :  { %1681 = vmatpush1.bf16.msra.mxu0 %v3835_v25  ;;  %v3891_v25 = vld [vmem:[#allocation4 + $0x2c4] ss:$16 sps:$4 sm:$0xff]  }
  0xe0   :  { %1682 = vmatprep.subr.bf16.mxu0 %v3843_v31  ;;  %v3895_v31 = vld [vmem:[#allocation4 + $0x2e0] ss:$16 sps:$4 sm:$0xff]  }
  0xe1   :  { %1763 = vmatpush1.bf16.msra.mxu1 %v3838_v30  ;;  %v3900_v30 = vld [vmem:[#allocation4 + $0x2ec] ss:$16 sps:$4 sm:$0xff]  }
  0xe2   :  { %1764 = vmatprep.subr.bf16.mxu1 %v3846_v32  ;;  %v3898_v32 = vld [vmem:[#allocation4 + $0x2e8] ss:$16 sps:$4 sm:$0xff]  }
  0xe3   :  { %1683 = vmatpush1.bf16.msra.mxu0 %v3841_v33  ;;  %v3903_v33 = vld [vmem:[#allocation4 + $0x304] ss:$16 sps:$4 sm:$0xff]  }
  0xe4   :  { %1684 = vmatprep.subr.bf16.mxu0 %v3849_v35  ;;  %v3901_v35 = vld [vmem:[#allocation4 + $0x300] ss:$16 sps:$4 sm:$0xff]  }
  0xe5   :  { %1765 = vmatpush1.bf16.msra.mxu1 %v3844_v34  ;;  %v3906_v34 = vld [vmem:[#allocation4 + $0x30c] ss:$16 sps:$4 sm:$0xff]  }
  0xe6   :  { %1766 = vmatprep.subr.bf16.mxu1 %v3852_v36  ;;  %v3904_v36 = vld [vmem:[#allocation4 + $0x308] ss:$16 sps:$4 sm:$0xff]  }
  0xe7   :  { %1685 = vmatpush1.bf16.msra.mxu0 %v3847_v37  ;;  %v3909_v37 = vld [vmem:[#allocation4 + $0x324] ss:$16 sps:$4 sm:$0xff]  }
  0xe8   :  { %1695 = vmatprep.subr.bf16.mxu0 %v3855_v39  ;;  %v3907_v39 = vld [vmem:[#allocation4 + $0x320] ss:$16 sps:$4 sm:$0xff]  }
  0xe9   :  { %1767 = vmatpush1.bf16.msra.mxu1 %v3850_v38  ;;  %v3912_v38 = vld [vmem:[#allocation4 + $0x32c] ss:$16 sps:$4 sm:$0xff]  }
  0xea   :  { %1777 = vmatprep.subr.bf16.mxu1 %v3858_v40  ;;  %v3910_v40 = vld [vmem:[#allocation4 + $0x328] ss:$16 sps:$4 sm:$0xff]  }
 0x17d   :  { %v767_v48 = vpop.f32.mrb[0].mxu0 }
 0x17e   :  { %v3568_v49 = vadd.f32 %v767_v48, %v195_v46  ;;  %v769_v50 = vpop.f32.mrb[1].mxu0  ;;  %v3918_v46 = vld [vmem:[#allocation4 + $0x34c] ss:$16 sps:$4 sm:$0xff]   ;;  %v3916_v48 = vld [vmem:[#allocation4 + $0x348] ss:$16 sps:$4 sm:$0xff]  }
 0x17f   :  { %v3569_v51 = vadd.f32 %v769_v50, %v199_v47  ;;  %v771_v52 = vpop.f32.mrb[2].mxu0  ;;  %v4428_v4 = vpop.f32.mrb[0].mxu1  ;;  %v3913_v47 = vld [vmem:[#allocation4 + $0x340] ss:$16 sps:$4 sm:$0xff]   ;;  %v3924_v50 = vld [vmem:[#allocation4 + $0x36c] ss:$16 sps:$4 sm:$0xff]  }
 0x180   :  { %v856_v53 = vmax.f32 %v3568_v49, 0.0  ;;  %v772_v54 = vpop.f32.mrb[3].mxu0  ;;  %v851_v5 = vpop.f32.mrb[1].mxu1  ;;  %v3921_v49 = vld [vmem:[#allocation4 + $0x364] ss:$16 sps:$4 sm:$0xff]  }
 0x181   :  { %v857_v55 = vmax.f32 %v3569_v51, 0.0  ;;  %v3571_v6 = vadd.f32 %v851_v5, %v207_v63  ;;  %v853_v7 = vpop.f32.mrb[2].mxu1  ;;  %v3919_v51 = vld [vmem:[#allocation4 + $0x360] ss:$16 sps:$4 sm:$0xff]   ;;  %v3922_v52 = vld [vmem:[#allocation4 + $0x368] ss:$16 sps:$4 sm:$0xff]  }
 0x182   :  { %v860_v60 = vpack.c.bf16 %v856_v53, %v856_v53  ;;  %v854_v10 = vpop.f32.mrb[3].mxu1  ;;  %v3927_v53 = vld [vmem:[#allocation4 + $0x384] ss:$16 sps:$4 sm:$0xff]   ;;  %v3930_v54 = vld [vmem:[#allocation4 + $0x38c] ss:$16 sps:$4 sm:$0xff]  }
 0x183   :  { %v861_v57 = vpack.c.bf16 %v857_v55, %v857_v55  ;;  %v859_v13 = vmax.f32 %v3571_v6, 0.0  ;;  %v3925_v55 = vld [vmem:[#allocation4 + $0x380] ss:$16 sps:$4 sm:$0xff]   ;;  %v3945_v5 = vld [vmem:[#allocation4 + $0x3e4] ss:$16 sps:$4 sm:$0xff]  }
 0x184   :  { %v3948_v6 = vld [vmem:[#allocation4 + $0x3ec] ss:$16 sps:$4 sm:$0xff]   ;;  %v3943_v7 = vld [vmem:[#allocation4 + $0x3e0] ss:$16 sps:$4 sm:$0xff]  }
 0x185   :  { %1686 = vmatprep.mubr.bf16.mxu0 %v861_v57  ;;  %1768 = vmatprep.mubr.bf16.mxu1 %v861_v57  ;;  %v863_v14 = vpack.c.bf16 %v859_v13, %v859_v13  ;;  %v3928_v57 = vld [vmem:[#allocation4 + $0x388] ss:$16 sps:$4 sm:$0xff]   ;;  %v3954_v10 = vld [vmem:[#allocation6 + $0xc] ss:$16 sps:$4 sm:$0xff]  }
 0x186   :  { %1687 = vmatmul.mubr.bf16.vlgmr.msra.gmra.mrb[4].mxu0 %v860_v60  ;;  %1769 = vmatmul.mubr.bf16.vlgmr.msra.gmra.mrb[4].mxu1 %v860_v60  ;;  %v3936_v60 = vld [vmem:[#allocation4 + $0x3ac] ss:$16 sps:$4 sm:$0xff]  }
 0x187   :  { %1696 = vmatpush1.bf16.msra.mxu0 %v3853_v58  ;;  %1778 = vmatpush1.bf16.msra.mxu1 %v3856_v59  ;;  %v4431_v58 = vsub.s32 2, %v4406_v42  ;;  %v3933_v59 = vld [vmem:[#allocation4 + $0x3a4] ss:$16 sps:$4 sm:$0xff]   ;;  %v3940_v42 = vld [vmem:[#allocation4 + $0x3c8] ss:$16 sps:$4 sm:$0xff]  }
 0x188   :  { %1697 = vmatprep.subr.bf16.mxu0 %v3861_v61  ;;  %1779 = vmatprep.subr.bf16.mxu1 %v3864_v62  ;;  %v3931_v61 = vld [vmem:[#allocation4 + $0x3a0] ss:$16 sps:$4 sm:$0xff]   ;;  %v3934_v62 = vld [vmem:[#allocation4 + $0x3a8] ss:$16 sps:$4 sm:$0xff]  }
 0x189   :  { %1727 = vmatprep.mubr.bf16.mxu0 %v863_v14  ;;  %1809 = vmatprep.mubr.bf16.mxu1 %v863_v14  ;;  %v203_v63 = vrot.slane %v4414_v44, %v4431_v58  ;;  %v3951_v44 = vld [vmem:[#allocation6 + $0x4] ss:$16 sps:$4 sm:$0xff]   ;;  %v3960_v14 = vld [vmem:[#allocation6 + $0x2c] ss:$16 sps:$4 sm:$0xff]  }
 0x18b   :  { %1698 = vmatpush1.bf16.msra.mxu0 %v3859_v0  ;;  %1780 = vmatpush1.bf16.msra.mxu1 %v3862_v1  ;;  %v3939_v0 = vld [vmem:[#allocation4 + $0x3c4] ss:$16 sps:$4 sm:$0xff]   ;;  %v3942_v1 = vld [vmem:[#allocation4 + $0x3cc] ss:$16 sps:$4 sm:$0xff]  }
 0x18c   :  { %1699 = vmatprep.subr.bf16.mxu0 %v3867_v2  ;;  %1781 = vmatprep.subr.bf16.mxu1 %v3870_v3  ;;  %v3937_v2 = vld [vmem:[#allocation4 + $0x3c0] ss:$16 sps:$4 sm:$0xff]   ;;  %v3570_v3 = vadd.f32 %v4428_v4, %v203_v63  ;;  %v3957_v4 = vld [vmem:[#allocation6 + $0x24] ss:$16 sps:$4 sm:$0xff]  }
 0x18d   :  { %v4023_v63 = vld [vmem:[#allocation6 + $0x184] ss:$16 sps:$4 sm:$0xff]  }
 0x18f   :  { %1700 = vmatpush1.bf16.msra.mxu0 %v3865_v8  ;;  %1782 = vmatpush1.bf16.msra.mxu1 %v3868_v9  ;;  %v3946_v8 = vld [vmem:[#allocation4 + $0x3e8] ss:$16 sps:$4 sm:$0xff]   ;;  %v858_v9 = vmax.f32 %v3570_v3, 0.0  ;;  %v4032_v3 = vld [vmem:[#allocation6 + $0x1ac] ss:$16 sps:$4 sm:$0xff]  }
 0x190   :  { %1701 = vmatprep.subr.bf16.mxu0 %v3873_v11  ;;  %1783 = vmatprep.subr.bf16.mxu1 %v3876_v12  ;;  %v3949_v11 = vld [vmem:[#allocation6] ss:$16 sps:$4 sm:$0xff]   ;;  %v3952_v12 = vld [vmem:[#allocation6 + $0x8] ss:$16 sps:$4 sm:$0xff]  }
 0x191   :  { %v862_v13 = vpack.c.bf16 %v858_v9, %v858_v9  ;;  %v4033_v9 = vld [vmem:[#allocation6 + $0x1c0] ss:$16 sps:$4 sm:$0xff]  }
 0x193   :  { %1702 = vmatpush1.bf16.msra.mxu0 %v3871_v15  ;;  %1784 = vmatpush1.bf16.msra.mxu1 %v3874_v16  ;;  %v3955_v15 = vld [vmem:[#allocation6 + $0x20] ss:$16 sps:$4 sm:$0xff]   ;;  %v3958_v16 = vld [vmem:[#allocation6 + $0x28] ss:$16 sps:$4 sm:$0xff]  }
 0x194   :  { %1703 = vmatprep.subr.bf16.mxu0 %v3879_v17  ;;  %1785 = vmatprep.subr.bf16.mxu1 %v3882_v18  ;;  %v3963_v17 = vld [vmem:[#allocation6 + $0x44] ss:$16 sps:$4 sm:$0xff]   ;;  %v3966_v18 = vld [vmem:[#allocation6 + $0x4c] ss:$16 sps:$4 sm:$0xff]  }
 0x197   :  { %1704 = vmatpush1.bf16.msra.mxu0 %v3877_v19  ;;  %1786 = vmatpush1.bf16.msra.mxu1 %v3880_v20  ;;  %v3961_v19 = vld [vmem:[#allocation6 + $0x40] ss:$16 sps:$4 sm:$0xff]   ;;  %v3964_v20 = vld [vmem:[#allocation6 + $0x48] ss:$16 sps:$4 sm:$0xff]  }
 0x198   :  { %1705 = vmatprep.subr.bf16.mxu0 %v3885_v21  ;;  %1787 = vmatprep.subr.bf16.mxu1 %v3888_v22  ;;  %v3969_v21 = vld [vmem:[#allocation6 + $0x64] ss:$16 sps:$4 sm:$0xff]   ;;  %v3972_v22 = vld [vmem:[#allocation6 + $0x6c] ss:$16 sps:$4 sm:$0xff]  }
 0x19b   :  { %1706 = vmatpush1.bf16.msra.mxu0 %v3883_v23  ;;  %1788 = vmatpush1.bf16.msra.mxu1 %v3886_v24  ;;  %v3967_v23 = vld [vmem:[#allocation6 + $0x60] ss:$16 sps:$4 sm:$0xff]   ;;  %v3970_v24 = vld [vmem:[#allocation6 + $0x68] ss:$16 sps:$4 sm:$0xff]  }
 0x19c   :  { %1707 = vmatprep.subr.bf16.mxu0 %v3891_v25  ;;  %1789 = vmatprep.subr.bf16.mxu1 %v3894_v26  ;;  %v3975_v25 = vld [vmem:[#allocation6 + $0x84] ss:$16 sps:$4 sm:$0xff]   ;;  %v3978_v26 = vld [vmem:[#allocation6 + $0x8c] ss:$16 sps:$4 sm:$0xff]  }
 0x19f   :  { %1708 = vmatpush1.bf16.msra.mxu0 %v3889_v27  ;;  %1790 = vmatpush1.bf16.msra.mxu1 %v3892_v28  ;;  %v3973_v27 = vld [vmem:[#allocation6 + $0x80] ss:$16 sps:$4 sm:$0xff]   ;;  %v3976_v28 = vld [vmem:[#allocation6 + $0x88] ss:$16 sps:$4 sm:$0xff]  }
 0x1a0   :  { %1709 = vmatprep.subr.bf16.mxu0 %v3897_v29  ;;  %1791 = vmatprep.subr.bf16.mxu1 %v3900_v30  ;;  %v3981_v29 = vld [vmem:[#allocation6 + $0xa4] ss:$16 sps:$4 sm:$0xff]   ;;  %v3984_v30 = vld [vmem:[#allocation6 + $0xac] ss:$16 sps:$4 sm:$0xff]  }
 0x1a3   :  { %1710 = vmatpush1.bf16.msra.mxu0 %v3895_v31  ;;  %1792 = vmatpush1.bf16.msra.mxu1 %v3898_v32  ;;  %v3979_v31 = vld [vmem:[#allocation6 + $0xa0] ss:$16 sps:$4 sm:$0xff]   ;;  %v3982_v32 = vld [vmem:[#allocation6 + $0xa8] ss:$16 sps:$4 sm:$0xff]  }
 0x1a4   :  { %1711 = vmatprep.subr.bf16.mxu0 %v3903_v33  ;;  %1793 = vmatprep.subr.bf16.mxu1 %v3906_v34  ;;  %v3987_v33 = vld [vmem:[#allocation6 + $0xc4] ss:$16 sps:$4 sm:$0xff]   ;;  %v3990_v34 = vld [vmem:[#allocation6 + $0xcc] ss:$16 sps:$4 sm:$0xff]  }
 0x1a7   :  { %1712 = vmatpush1.bf16.msra.mxu0 %v3901_v35  ;;  %1794 = vmatpush1.bf16.msra.mxu1 %v3904_v36  ;;  %v3985_v35 = vld [vmem:[#allocation6 + $0xc0] ss:$16 sps:$4 sm:$0xff]   ;;  %v3988_v36 = vld [vmem:[#allocation6 + $0xc8] ss:$16 sps:$4 sm:$0xff]  }
 0x1a8   :  { %1713 = vmatprep.subr.bf16.mxu0 %v3909_v37  ;;  %1795 = vmatprep.subr.bf16.mxu1 %v3912_v38  ;;  %v3993_v37 = vld [vmem:[#allocation6 + $0xe4] ss:$16 sps:$4 sm:$0xff]   ;;  %v3996_v38 = vld [vmem:[#allocation6 + $0xec] ss:$16 sps:$4 sm:$0xff]  }
 0x1ab   :  { %1714 = vmatpush1.bf16.msra.mxu0 %v3907_v39  ;;  %1796 = vmatpush1.bf16.msra.mxu1 %v3910_v40  ;;  %v3991_v39 = vld [vmem:[#allocation6 + $0xe0] ss:$16 sps:$4 sm:$0xff]   ;;  %v3994_v40 = vld [vmem:[#allocation6 + $0xe8] ss:$16 sps:$4 sm:$0xff]  }
 0x1ac   :  { %1715 = vmatprep.subr.bf16.mxu0 %v3915_v41  ;;  %1797 = vmatprep.subr.bf16.mxu1 %v3918_v46  ;;  %v3999_v41 = vld [vmem:[#allocation6 + $0x104] ss:$16 sps:$4 sm:$0xff]   ;;  %v4002_v46 = vld [vmem:[#allocation6 + $0x10c] ss:$16 sps:$4 sm:$0xff]  }
 0x1af   :  { %1716 = vmatpush1.bf16.msra.mxu0 %v3913_v47  ;;  %1798 = vmatpush1.bf16.msra.mxu1 %v3916_v48  ;;  %v3997_v47 = vld [vmem:[#allocation6 + $0x100] ss:$16 sps:$4 sm:$0xff]   ;;  %v4000_v48 = vld [vmem:[#allocation6 + $0x108] ss:$16 sps:$4 sm:$0xff]  }
 0x1b0   :  { %1717 = vmatprep.subr.bf16.mxu0 %v3921_v49  ;;  %1799 = vmatprep.subr.bf16.mxu1 %v3924_v50  ;;  %v4005_v49 = vld [vmem:[#allocation6 + $0x124] ss:$16 sps:$4 sm:$0xff]   ;;  %v4008_v50 = vld [vmem:[#allocation6 + $0x12c] ss:$16 sps:$4 sm:$0xff]  }
 0x1b3   :  { %1718 = vmatpush1.bf16.msra.mxu0 %v3919_v51  ;;  %1800 = vmatpush1.bf16.msra.mxu1 %v3922_v52  ;;  %v4003_v51 = vld [vmem:[#allocation6 + $0x120] ss:$16 sps:$4 sm:$0xff]   ;;  %v4006_v52 = vld [vmem:[#allocation6 + $0x128] ss:$16 sps:$4 sm:$0xff]  }
 0x1b4   :  { %1719 = vmatprep.subr.bf16.mxu0 %v3927_v53  ;;  %1801 = vmatprep.subr.bf16.mxu1 %v3930_v54  ;;  %v4011_v53 = vld [vmem:[#allocation6 + $0x144] ss:$16 sps:$4 sm:$0xff]   ;;  %v4014_v54 = vld [vmem:[#allocation6 + $0x14c] ss:$16 sps:$4 sm:$0xff]  }
 0x1b7   :  { %1720 = vmatpush1.bf16.msra.mxu0 %v3925_v55  ;;  %1802 = vmatpush1.bf16.msra.mxu1 %v3928_v57  ;;  %v4009_v55 = vld [vmem:[#allocation6 + $0x140] ss:$16 sps:$4 sm:$0xff]   ;;  %v4012_v57 = vld [vmem:[#allocation6 + $0x148] ss:$16 sps:$4 sm:$0xff]  }
 0x1b8   :  { %1721 = vmatprep.subr.bf16.mxu0 %v3933_v59  ;;  %1803 = vmatprep.subr.bf16.mxu1 %v3936_v60  ;;  %v4017_v59 = vld [vmem:[#allocation6 + $0x164] ss:$16 sps:$4 sm:$0xff]   ;;  %v4020_v60 = vld [vmem:[#allocation6 + $0x16c] ss:$16 sps:$4 sm:$0xff]  }
 0x1bb   :  { %1722 = vmatpush1.bf16.msra.mxu0 %v3931_v61  ;;  %1804 = vmatpush1.bf16.msra.mxu1 %v3934_v62  ;;  %v4015_v61 = vld [vmem:[#allocation6 + $0x160] ss:$16 sps:$4 sm:$0xff]   ;;  %v4018_v62 = vld [vmem:[#allocation6 + $0x168] ss:$16 sps:$4 sm:$0xff]  }
 0x1bc   :  { %1723 = vmatprep.subr.bf16.mxu0 %v3939_v0  ;;  %1805 = vmatprep.subr.bf16.mxu1 %v3942_v1  ;;  %v4026_v0 = vld [vmem:[#allocation6 + $0x18c] ss:$16 sps:$4 sm:$0xff]   ;;  %v4021_v1 = vld [vmem:[#allocation6 + $0x180] ss:$16 sps:$4 sm:$0xff]  }
 0x1bf   :  { %1724 = vmatpush1.bf16.msra.mxu0 %v3937_v2  ;;  %1806 = vmatpush1.bf16.msra.mxu1 %v3940_v42  ;;  %v4024_v2 = vld [vmem:[#allocation6 + $0x188] ss:$16 sps:$4 sm:$0xff]   ;;  %v4029_v42 = vld [vmem:[#allocation6 + $0x1a4] ss:$16 sps:$4 sm:$0xff]  }
 0x1c0   :  { %1725 = vmatprep.subr.bf16.mxu0 %v3945_v5  ;;  %1807 = vmatprep.subr.bf16.mxu1 %v3948_v6  ;;  %v4027_v5 = vld [vmem:[#allocation6 + $0x1a0] ss:$16 sps:$4 sm:$0xff]   ;;  %v4030_v6 = vld [vmem:[#allocation6 + $0x1a8] ss:$16 sps:$4 sm:$0xff]  }
 0x1c3   :  { %1726 = vmatpush1.bf16.msra.mxu0 %v3943_v7  ;;  %1808 = vmatpush1.bf16.msra.mxu1 %v3946_v8  ;;  %v4035_v7 = vld [vmem:[#allocation6 + $0x1c4] ss:$16 sps:$4 sm:$0xff]   ;;  %v4038_v8 = vld [vmem:[#allocation6 + $0x1cc] ss:$16 sps:$4 sm:$0xff]  }
 0x1c4   :  { %2616 = vmatprep.subr.bf16.mxu0 %v3951_v44  ;;  %2698 = vmatprep.subr.bf16.mxu1 %v3954_v10  ;;  %v4036_v44 = vld [vmem:[#allocation6 + $0x1c8] ss:$16 sps:$4 sm:$0xff]   ;;  %v4041_v10 = vld [vmem:[#allocation6 + $0x1e4] ss:$16 sps:$4 sm:$0xff]  }
 0x1c6   :  { %1728 = vmatmul.mubr.bf16.vlgmr.msra.gmra.mrb[4].mxu0 %v862_v13  ;;  %1810 = vmatmul.mubr.bf16.vlgmr.msra.gmra.mrb[4].mxu1 %v862_v13  ;;  %v4042_v13 = vld [vmem:[#allocation6 + $0x1e8] ss:$16 sps:$4 sm:$0xff]  }
 0x1c7   :  { %2617 = vmatpush1.bf16.msra.mxu0 %v3949_v11  ;;  %2699 = vmatpush1.bf16.msra.mxu1 %v3952_v12  ;;  %v4044_v11 = vld [vmem:[#allocation6 + $0x1ec] ss:$16 sps:$4 sm:$0xff]   ;;  %v4039_v12 = vld [vmem:[#allocation6 + $0x1e0] ss:$16 sps:$4 sm:$0xff]  }
 0x1c8   :  { %2618 = vmatprep.subr.bf16.mxu0 %v3957_v4  ;;  %2700 = vmatprep.subr.bf16.mxu1 %v3960_v14  ;;  %v4047_v4 = vld [vmem:[#allocation6 + $0x204] ss:$16 sps:$4 sm:$0xff]   ;;  %v4050_v14 = vld [vmem:[#allocation6 + $0x20c] ss:$16 sps:$4 sm:$0xff]  }
 0x1cb   :  { %2619 = vmatpush1.bf16.msra.mxu0 %v3955_v15  ;;  %2701 = vmatpush1.bf16.msra.mxu1 %v3958_v16  ;;  %v4439_v15 = vld [vmem:[%s4469_s4] sm:$0xf] }
 0x1cc   :  { %2620 = vmatprep.subr.bf16.mxu0 %v3963_v17  ;;  %2702 = vmatprep.subr.bf16.mxu1 %v3966_v18  ;;  %v997_v16 = vrot.slane %v4439_v15, %v4409_v43  ;;  %v1001_v17 = vrot.slane %v4439_v15, %v4417_v45  ;;  %v1009_v18 = vrot.slane %v4439_v15, %v4424_v56 }
 0x1cf   :  { %2621 = vmatpush1.bf16.msra.mxu0 %v3961_v19  ;;  %2703 = vmatpush1.bf16.msra.mxu1 %v3964_v20 }
 0x1d0   :  { %2622 = vmatprep.subr.bf16.mxu0 %v3969_v21  ;;  %2704 = vmatprep.subr.bf16.mxu1 %v3972_v22 }
 0x1d3   :  { %2623 = vmatpush1.bf16.msra.mxu0 %v3967_v23  ;;  %2705 = vmatpush1.bf16.msra.mxu1 %v3970_v24 }
 0x1d4   :  { %2624 = vmatprep.subr.bf16.mxu0 %v3975_v25  ;;  %2706 = vmatprep.subr.bf16.mxu1 %v3978_v26 }
 0x1d7   :  { %2625 = vmatpush1.bf16.msra.mxu0 %v3973_v27  ;;  %2707 = vmatpush1.bf16.msra.mxu1 %v3976_v28 }
 0x1d8   :  { %2626 = vmatprep.subr.bf16.mxu0 %v3981_v29  ;;  %2708 = vmatprep.subr.bf16.mxu1 %v3984_v30 }
 0x1db   :  { %2627 = vmatpush1.bf16.msra.mxu0 %v3979_v31  ;;  %2709 = vmatpush1.bf16.msra.mxu1 %v3982_v32 }
 0x1dc   :  { %2628 = vmatprep.subr.bf16.mxu0 %v3987_v33  ;;  %2710 = vmatprep.subr.bf16.mxu1 %v3990_v34  ;;  %v4045_v34 = vld [vmem:[#allocation6 + $0x200] ss:$16 sps:$4 sm:$0xff]  }
 0x1df   :  { %2629 = vmatpush1.bf16.msra.mxu0 %v3985_v35  ;;  %2711 = vmatpush1.bf16.msra.mxu1 %v3988_v36  ;;  %v4048_v35 = vld [vmem:[#allocation6 + $0x208] ss:$16 sps:$4 sm:$0xff]  }
 0x1e0   :  { %2630 = vmatprep.subr.bf16.mxu0 %v3993_v37  ;;  %2712 = vmatprep.subr.bf16.mxu1 %v3996_v38  ;;  %v4053_v37 = vld [vmem:[#allocation6 + $0x224] ss:$16 sps:$4 sm:$0xff]   ;;  %v4056_v38 = vld [vmem:[#allocation6 + $0x22c] ss:$16 sps:$4 sm:$0xff]  }
 0x1e3   :  { %2631 = vmatpush1.bf16.msra.mxu0 %v3991_v39  ;;  %2713 = vmatpush1.bf16.msra.mxu1 %v3994_v40  ;;  %v4051_v40 = vld [vmem:[#allocation6 + $0x220] ss:$16 sps:$4 sm:$0xff]  }
 0x1e4   :  { %2632 = vmatprep.subr.bf16.mxu0 %v3999_v41  ;;  %2714 = vmatprep.subr.bf16.mxu1 %v4002_v46  ;;  %v4054_v41 = vld [vmem:[#allocation6 + $0x228] ss:$16 sps:$4 sm:$0xff]   ;;  %v4059_v46 = vld [vmem:[#allocation6 + $0x244] ss:$16 sps:$4 sm:$0xff]  }
 0x1e7   :  { %2633 = vmatpush1.bf16.msra.mxu0 %v3997_v47  ;;  %2715 = vmatpush1.bf16.msra.mxu1 %v4000_v48  ;;  %v4062_v47 = vld [vmem:[#allocation6 + $0x24c] ss:$16 sps:$4 sm:$0xff]   ;;  %v4057_v48 = vld [vmem:[#allocation6 + $0x240] ss:$16 sps:$4 sm:$0xff]  }
 0x1e8   :  { %2634 = vmatprep.subr.bf16.mxu0 %v4005_v49  ;;  %2716 = vmatprep.subr.bf16.mxu1 %v4008_v50  ;;  %v4060_v49 = vld [vmem:[#allocation6 + $0x248] ss:$16 sps:$4 sm:$0xff]   ;;  %v4065_v50 = vld [vmem:[#allocation6 + $0x264] ss:$16 sps:$4 sm:$0xff]  }
 0x1eb   :  { %2635 = vmatpush1.bf16.msra.mxu0 %v4003_v51  ;;  %2717 = vmatpush1.bf16.msra.mxu1 %v4006_v52  ;;  %v4068_v51 = vld [vmem:[#allocation6 + $0x26c] ss:$16 sps:$4 sm:$0xff]   ;;  %v4063_v52 = vld [vmem:[#allocation6 + $0x260] ss:$16 sps:$4 sm:$0xff]  }
 0x1ec   :  { %2636 = vmatprep.subr.bf16.mxu0 %v4011_v53  ;;  %2718 = vmatprep.subr.bf16.mxu1 %v4014_v54  ;;  %v4066_v53 = vld [vmem:[#allocation6 + $0x268] ss:$16 sps:$4 sm:$0xff]   ;;  %v4071_v54 = vld [vmem:[#allocation6 + $0x284] ss:$16 sps:$4 sm:$0xff]  }
 0x1ef   :  { %2637 = vmatpush1.bf16.msra.mxu0 %v4009_v55  ;;  %2719 = vmatpush1.bf16.msra.mxu1 %v4012_v57  ;;  %v4074_v55 = vld [vmem:[#allocation6 + $0x28c] ss:$16 sps:$4 sm:$0xff]   ;;  %v4069_v57 = vld [vmem:[#allocation6 + $0x280] ss:$16 sps:$4 sm:$0xff]  }
 0x1f0   :  { %2638 = vmatprep.subr.bf16.mxu0 %v4017_v59  ;;  %2720 = vmatprep.subr.bf16.mxu1 %v4020_v60  ;;  %v4072_v59 = vld [vmem:[#allocation6 + $0x288] ss:$16 sps:$4 sm:$0xff]   ;;  %v4077_v60 = vld [vmem:[#allocation6 + $0x2a4] ss:$16 sps:$4 sm:$0xff]  }
 0x1f3   :  { %2639 = vmatpush1.bf16.msra.mxu0 %v4015_v61  ;;  %2721 = vmatpush1.bf16.msra.mxu1 %v4018_v62  ;;  %v4080_v61 = vld [vmem:[#allocation6 + $0x2ac] ss:$16 sps:$4 sm:$0xff]   ;;  %v4075_v62 = vld [vmem:[#allocation6 + $0x2a0] ss:$16 sps:$4 sm:$0xff]  }
 0x1f4   :  { %2640 = vmatprep.subr.bf16.mxu0 %v4023_v63  ;;  %2722 = vmatprep.subr.bf16.mxu1 %v4026_v0  ;;  %v4078_v63 = vld [vmem:[#allocation6 + $0x2a8] ss:$16 sps:$4 sm:$0xff]   ;;  %v4083_v0 = vld [vmem:[#allocation6 + $0x2c4] ss:$16 sps:$4 sm:$0xff]  }
 0x1f7   :  { %2641 = vmatpush1.bf16.msra.mxu0 %v4021_v1  ;;  %2723 = vmatpush1.bf16.msra.mxu1 %v4024_v2  ;;  %v4086_v1 = vld [vmem:[#allocation6 + $0x2cc] ss:$16 sps:$4 sm:$0xff]   ;;  %v4081_v2 = vld [vmem:[#allocation6 + $0x2c0] ss:$16 sps:$4 sm:$0xff]  }
 0x1f8   :  { %2642 = vmatprep.subr.bf16.mxu0 %v4029_v42  ;;  %2724 = vmatprep.subr.bf16.mxu1 %v4032_v3  ;;  %v4084_v42 = vld [vmem:[#allocation6 + $0x2c8] ss:$16 sps:$4 sm:$0xff]   ;;  %v4089_v3 = vld [vmem:[#allocation6 + $0x2e4] ss:$16 sps:$4 sm:$0xff]  }
 0x1fb   :  { %2643 = vmatpush1.bf16.msra.mxu0 %v4027_v5  ;;  %2725 = vmatpush1.bf16.msra.mxu1 %v4030_v6  ;;  %v4092_v5 = vld [vmem:[#allocation6 + $0x2ec] ss:$16 sps:$4 sm:$0xff]   ;;  %v4087_v6 = vld [vmem:[#allocation6 + $0x2e0] ss:$16 sps:$4 sm:$0xff]  }
 0x1fc   :  { %2644 = vmatprep.subr.bf16.mxu0 %v4035_v7  ;;  %2726 = vmatprep.subr.bf16.mxu1 %v4038_v8  ;;  %v4090_v7 = vld [vmem:[#allocation6 + $0x2e8] ss:$16 sps:$4 sm:$0xff]   ;;  %v4095_v8 = vld [vmem:[#allocation6 + $0x304] ss:$16 sps:$4 sm:$0xff]  }
 0x1ff   :  { %2645 = vmatpush1.bf16.msra.mxu0 %v4033_v9  ;;  %2727 = vmatpush1.bf16.msra.mxu1 %v4036_v44  ;;  %v4098_v9 = vld [vmem:[#allocation6 + $0x30c] ss:$16 sps:$4 sm:$0xff]   ;;  %v4093_v44 = vld [vmem:[#allocation6 + $0x300] ss:$16 sps:$4 sm:$0xff]  }
 0x200   :  { %2646 = vmatprep.subr.bf16.mxu0 %v4041_v10  ;;  %2728 = vmatprep.subr.bf16.mxu1 %v4044_v11  ;;  %v4096_v10 = vld [vmem:[#allocation6 + $0x308] ss:$16 sps:$4 sm:$0xff]   ;;  %v4101_v11 = vld [vmem:[#allocation6 + $0x324] ss:$16 sps:$4 sm:$0xff]  }
 0x203   :  { %2647 = vmatpush1.bf16.msra.mxu0 %v4039_v12  ;;  %2729 = vmatpush1.bf16.msra.mxu1 %v4042_v13  ;;  %v4104_v12 = vld [vmem:[#allocation6 + $0x32c] ss:$16 sps:$4 sm:$0xff]   ;;  %v4099_v13 = vld [vmem:[#allocation6 + $0x320] ss:$16 sps:$4 sm:$0xff]  }
 0x204   :  { %2657 = vmatprep.subr.bf16.mxu0 %v4047_v4  ;;  %2739 = vmatprep.subr.bf16.mxu1 %v4050_v14  ;;  %v4102_v4 = vld [vmem:[#allocation6 + $0x328] ss:$16 sps:$4 sm:$0xff]   ;;  %v4107_v14 = vld [vmem:[#allocation6 + $0x344] ss:$16 sps:$4 sm:$0xff]  }
 0x299   :  { %v1729_v19 = vpop.f32.mrb[4].mxu0  ;;  %v4447_v20 = vpop.f32.mrb[4].mxu1 }
 0x29a   :  { %v3572_v21 = vadd.f32 %v1729_v19, %v997_v16  ;;  %v1731_v22 = vpop.f32.mrb[5].mxu0  ;;  %v1813_v23 = vpop.f32.mrb[5].mxu1  ;;  %v4110_v16 = vld [vmem:[#allocation6 + $0x34c] ss:$16 sps:$4 sm:$0xff]   ;;  %v4113_v19 = vld [vmem:[#allocation6 + $0x364] ss:$16 sps:$4 sm:$0xff]  }
 0x29b   :  { %v3573_v24 = vadd.f32 %v1731_v22, %v1001_v17  ;;  %v3575_v25 = vadd.f32 %v1813_v23, %v1009_v18  ;;  %v1733_v26 = vpop.f32.mrb[6].mxu0  ;;  %v1815_v27 = vpop.f32.mrb[6].mxu1  ;;  %v4105_v17 = vld [vmem:[#allocation6 + $0x340] ss:$16 sps:$4 sm:$0xff]   ;;  %v4108_v18 = vld [vmem:[#allocation6 + $0x348] ss:$16 sps:$4 sm:$0xff]  }
 0x29c   :  { %v1818_v28 = vmax.f32 %v3572_v21, 0.0  ;;  %v1734_v29 = vpop.f32.mrb[7].mxu0  ;;  %v1816_v30 = vpop.f32.mrb[7].mxu1  ;;  %v4116_v21 = vld [vmem:[#allocation6 + $0x36c] ss:$16 sps:$4 sm:$0xff]  }
 0x29d   :  { %v1819_v31 = vmax.f32 %v3573_v24, 0.0  ;;  %v1821_v32 = vmax.f32 %v3575_v25, 0.0  ;;  %v4111_v22 = vld [vmem:[#allocation6 + $0x360] ss:$16 sps:$4 sm:$0xff]   ;;  %v4114_v23 = vld [vmem:[#allocation6 + $0x368] ss:$16 sps:$4 sm:$0xff]  }
 0x29e   :  { %v1822_v36 = vpack.c.bf16 %v1818_v28, %v1818_v28  ;;  %v4119_v24 = vld [vmem:[#allocation6 + $0x384] ss:$16 sps:$4 sm:$0xff]   ;;  %v4122_v25 = vld [vmem:[#allocation6 + $0x38c] ss:$16 sps:$4 sm:$0xff]   ;;  %v4117_v26 = vld [vmem:[#allocation6 + $0x380] ss:$16 sps:$4 sm:$0xff]  }
 0x29f   :  { %v1823_v33 = vpack.c.bf16 %v1819_v31, %v1819_v31  ;;  %v1825_v39 = vpack.c.bf16 %v1821_v32, %v1821_v32  ;;  %v4120_v27 = vld [vmem:[#allocation6 + $0x388] ss:$16 sps:$4 sm:$0xff]   ;;  %v4125_v28 = vld [vmem:[#allocation6 + $0x3a4] ss:$16 sps:$4 sm:$0xff]   ;;  %v4128_v29 = vld [vmem:[#allocation6 + $0x3ac] ss:$16 sps:$4 sm:$0xff]   ;;  %v1005_v32 = vrot.slane %v4439_v15, %v4431_v58 }
 0x2a0   :  { %v4123_v30 = vld [vmem:[#allocation6 + $0x3a0] ss:$16 sps:$4 sm:$0xff]   ;;  %v4126_v31 = vld [vmem:[#allocation6 + $0x3a8] ss:$16 sps:$4 sm:$0xff]  }
 0x2a1   :  { %2648 = vmatprep.mubr.bf16.mxu0 %v1823_v33  ;;  %2730 = vmatprep.mubr.bf16.mxu1 %v1823_v33  ;;  %v4131_v33 = vld [vmem:[#allocation6 + $0x3c4] ss:$16 sps:$4 sm:$0xff]  }
 0x2a2   :  { %2649 = vmatmul.mubr.bf16.vlgmr.msra.gmra.mrb[8].mxu0 %v1822_v36  ;;  %2731 = vmatmul.mubr.bf16.vlgmr.msra.gmra.mrb[8].mxu1 %v1822_v36  ;;  %v4132_v36 = vld [vmem:[#allocation6 + $0x3c8] ss:$16 sps:$4 sm:$0xff]   ;;  %v4141_v15 = vld [vmem:[#allocation7 + $0x40] sm:$0xff]  }
 0x2a3   :  { %2658 = vmatpush1.bf16.msra.mxu0 %v4045_v34  ;;  %2740 = vmatpush1.bf16.msra.mxu1 %v4048_v35  ;;  %v4134_v34 = vld [vmem:[#allocation6 + $0x3cc] ss:$16 sps:$4 sm:$0xff]   ;;  %v4129_v35 = vld [vmem:[#allocation6 + $0x3c0] ss:$16 sps:$4 sm:$0xff]  }
 0x2a4   :  { %2689 = vmatprep.mubr.bf16.mxu0 %v1825_v39  ;;  %2771 = vmatprep.mubr.bf16.mxu1 %v1825_v39  ;;  %v4140_v39 = vld [vmem:[#allocation6 + $0x3ec] ss:$16 sps:$4 sm:$0xff]  }
 0x2a5   :  { %2659 = vmatprep.subr.bf16.mxu0 %v4053_v37  ;;  %2741 = vmatprep.subr.bf16.mxu1 %v4056_v38  ;;  %v3574_v37 = vadd.f32 %v4447_v20, %v1005_v32  ;;  %v4137_v38 = vld [vmem:[#allocation6 + $0x3e4] ss:$16 sps:$4 sm:$0xff]   ;;  %v4145_v20 = vld [vmem:[#allocation7 + $0x48] sm:$0xff]  }
 0x2a7   :  { %2660 = vmatpush1.bf16.msra.mxu0 %v4051_v40  ;;  %2742 = vmatpush1.bf16.msra.mxu1 %v4054_v41  ;;  %v4135_v40 = vld [vmem:[#allocation6 + $0x3e0] ss:$16 sps:$4 sm:$0xff]   ;;  %v4138_v41 = vld [vmem:[#allocation6 + $0x3e8] ss:$16 sps:$4 sm:$0xff]  }
 0x2a8   :  { %2661 = vmatprep.subr.bf16.mxu0 %v4059_v46  ;;  %2743 = vmatprep.subr.bf16.mxu1 %v4062_v47  ;;  %v1820_v46 = vmax.f32 %v3574_v37, 0.0  ;;  %v4142_v47 = vld [vmem:[#allocation7 + $0xc0] sm:$0xff]  }
 0x2ab   :  { %2662 = vmatpush1.bf16.msra.mxu0 %v4057_v48  ;;  %2744 = vmatpush1.bf16.msra.mxu1 %v4060_v49  ;;  %v4143_v48 = vld [vmem:[#allocation7] sm:$0xff]  }
 0x2ac   :  { %2663 = vmatprep.subr.bf16.mxu0 %v4065_v50  ;;  %2745 = vmatprep.subr.bf16.mxu1 %v4068_v51  ;;  %v4144_v49 = vld [vmem:[#allocation7 + $0x80] sm:$0xff]   ;;  %v1824_v50 = vpack.c.bf16 %v1820_v46, %v1820_v46  ;;  %v4146_v51 = vld [vmem:[#allocation7 + $0xc8] sm:$0xff]  }
 0x2af   :  { %2664 = vmatpush1.bf16.msra.mxu0 %v4063_v52  ;;  %2746 = vmatpush1.bf16.msra.mxu1 %v4066_v53  ;;  %v4147_v52 = vld [vmem:[#allocation7 + $0x8] sm:$0xff]  }
 0x2b0   :  { %2665 = vmatprep.subr.bf16.mxu0 %v4071_v54  ;;  %2747 = vmatprep.subr.bf16.mxu1 %v4074_v55  ;;  %v4148_v53 = vld [vmem:[#allocation7 + $0x88] sm:$0xff]   ;;  %v4149_v54 = vld [vmem:[#allocation7 + $0x50] sm:$0xff]  }
 0x2b1   :  { %v4150_v55 = vld [vmem:[#allocation7 + $0xd0] sm:$0xff]  }
 0x2b3   :  { %2666 = vmatpush1.bf16.msra.mxu0 %v4069_v57  ;;  %2748 = vmatpush1.bf16.msra.mxu1 %v4072_v59  ;;  %v4151_v57 = vld [vmem:[#allocation7 + $0x10] sm:$0xff]  }
 0x2b4   :  { %2667 = vmatprep.subr.bf16.mxu0 %v4077_v60  ;;  %2749 = vmatprep.subr.bf16.mxu1 %v4080_v61  ;;  %v4152_v59 = vld [vmem:[#allocation7 + $0x90] sm:$0xff]   ;;  %v4153_v60 = vld [vmem:[#allocation7 + $0x58] sm:$0xff]  }
 0x2b5   :  { %v4154_v61 = vld [vmem:[#allocation7 + $0xd8] sm:$0xff]  }
 0x2b7   :  { %2668 = vmatpush1.bf16.msra.mxu0 %v4075_v62  ;;  %2750 = vmatpush1.bf16.msra.mxu1 %v4078_v63  ;;  %v4155_v62 = vld [vmem:[#allocation7 + $0x18] sm:$0xff]  }
 0x2b8   :  { %2669 = vmatprep.subr.bf16.mxu0 %v4083_v0  ;;  %2751 = vmatprep.subr.bf16.mxu1 %v4086_v1  ;;  %v4156_v63 = vld [vmem:[#allocation7 + $0x98] sm:$0xff]   ;;  %v4157_v0 = vld [vmem:[#allocation7 + $0x60] sm:$0xff]  }
 0x2b9   :  { %v4158_v1 = vld [vmem:[#allocation7 + $0xe0] sm:$0xff]  }
 0x2bb   :  { %2670 = vmatpush1.bf16.msra.mxu0 %v4081_v2  ;;  %2752 = vmatpush1.bf16.msra.mxu1 %v4084_v42  ;;  %v4159_v2 = vld [vmem:[#allocation7 + $0x20] sm:$0xff]  }
 0x2bc   :  { %2671 = vmatprep.subr.bf16.mxu0 %v4089_v3  ;;  %2753 = vmatprep.subr.bf16.mxu1 %v4092_v5  ;;  %v4160_v42 = vld [vmem:[#allocation7 + $0xa0] sm:$0xff]   ;;  %v4161_v3 = vld [vmem:[#allocation7 + $0x68] sm:$0xff]  }
 0x2bd   :  { %v4162_v5 = vld [vmem:[#allocation7 + $0xe8] sm:$0xff]  }
 0x2bf   :  { %2672 = vmatpush1.bf16.msra.mxu0 %v4087_v6  ;;  %2754 = vmatpush1.bf16.msra.mxu1 %v4090_v7  ;;  %v4163_v6 = vld [vmem:[#allocation7 + $0x28] sm:$0xff]  }
 0x2c0   :  { %2673 = vmatprep.subr.bf16.mxu0 %v4095_v8  ;;  %2755 = vmatprep.subr.bf16.mxu1 %v4098_v9  ;;  %v4164_v7 = vld [vmem:[#allocation7 + $0xa8] sm:$0xff]   ;;  %v4165_v8 = vld [vmem:[#allocation7 + $0x70] sm:$0xff]  }
 0x2c1   :  { %v4166_v9 = vld [vmem:[#allocation7 + $0xf0] sm:$0xff]  }
 0x2c3   :  { %2674 = vmatpush1.bf16.msra.mxu0 %v4093_v44  ;;  %2756 = vmatpush1.bf16.msra.mxu1 %v4096_v10  ;;  %v4167_v44 = vld [vmem:[#allocation7 + $0x30] sm:$0xff]  }
 0x2c4   :  { %2675 = vmatprep.subr.bf16.mxu0 %v4101_v11  ;;  %2757 = vmatprep.subr.bf16.mxu1 %v4104_v12  ;;  %v4168_v10 = vld [vmem:[#allocation7 + $0xb0] sm:$0xff]   ;;  %v4169_v11 = vld [vmem:[#allocation7 + $0x78] sm:$0xff]  }
 0x2c5   :  { %v4170_v12 = vld [vmem:[#allocation7 + $0xf8] sm:$0xff]  }
 0x2c7   :  { %2676 = vmatpush1.bf16.msra.mxu0 %v4099_v13  ;;  %2758 = vmatpush1.bf16.msra.mxu1 %v4102_v4  ;;  %v4171_v13 = vld [vmem:[#allocation7 + $0x38] sm:$0xff]  }
 0x2c8   :  { %2677 = vmatprep.subr.bf16.mxu0 %v4107_v14  ;;  %2759 = vmatprep.subr.bf16.mxu1 %v4110_v16  ;;  %v4172_v4 = vld [vmem:[#allocation7 + $0xb8] sm:$0xff]   ;;  %v1954_v14 = vld [vmem:[%s4471_s6] sm:$0xf] }
 0x2c9   :  { %v1959_v16 = vrot.slane %v1954_v14, %v4409_v43 }
 0x2cb   :  { %2678 = vmatpush1.bf16.msra.mxu0 %v4105_v17  ;;  %2760 = vmatpush1.bf16.msra.mxu1 %v4108_v18  ;;  %v1967_v17 = vrot.slane %v1954_v14, %v4431_v58  ;;  %v1963_v18 = vrot.slane %v1954_v14, %v4417_v45 }
 0x2cc   :  { %2679 = vmatprep.subr.bf16.mxu0 %v4113_v19  ;;  %2761 = vmatprep.subr.bf16.mxu1 %v4116_v21  ;;  %v1971_v19 = vrot.slane %v1954_v14, %v4424_v56 }
 0x2cf   :  { %2680 = vmatpush1.bf16.msra.mxu0 %v4111_v22  ;;  %2762 = vmatpush1.bf16.msra.mxu1 %v4114_v23 }
 0x2d0   :  { %2681 = vmatprep.subr.bf16.mxu0 %v4119_v24  ;;  %2763 = vmatprep.subr.bf16.mxu1 %v4122_v25 }
 0x2d3   :  { %2682 = vmatpush1.bf16.msra.mxu0 %v4117_v26  ;;  %2764 = vmatpush1.bf16.msra.mxu1 %v4120_v27 }
 0x2d4   :  { %2683 = vmatprep.subr.bf16.mxu0 %v4125_v28  ;;  %2765 = vmatprep.subr.bf16.mxu1 %v4128_v29 }
 0x2d7   :  { %2684 = vmatpush1.bf16.msra.mxu0 %v4123_v30  ;;  %2766 = vmatpush1.bf16.msra.mxu1 %v4126_v31 }
 0x2d8   :  { %2685 = vmatprep.subr.bf16.mxu0 %v4131_v33  ;;  %2767 = vmatprep.subr.bf16.mxu1 %v4134_v34 }
 0x2db   :  { %2686 = vmatpush1.bf16.msra.mxu0 %v4129_v35  ;;  %2768 = vmatpush1.bf16.msra.mxu1 %v4132_v36 }
 0x2dc   :  { %2687 = vmatprep.subr.bf16.mxu0 %v4137_v38  ;;  %2769 = vmatprep.subr.bf16.mxu1 %v4140_v39  ;;  %v3491_v39 = vld [vmem:[%s4473_s8] ss:$0 sm:$0xff] }
 0x2df   :  { %2688 = vmatpush1.bf16.msra.mxu0 %v4135_v40  ;;  %2770 = vmatpush1.bf16.msra.mxu1 %v4138_v41 }
 0x2e0   :  { %3524 = vmatprep.subr.bf16.mxu0 %v4141_v15  ;;  %3546 = vmatprep.subr.bf16.mxu1 %v4142_v47 }
 0x2e2   :  { %2690 = vmatmul.mubr.bf16.vlgmr.msra.gmra.mrb[8].mxu0 %v1824_v50  ;;  %2772 = vmatmul.mubr.bf16.vlgmr.msra.gmra.mrb[8].mxu1 %v1824_v50 }
 0x2e3   :  { %3525 = vmatpush3.bf16.msra.mxu0 %v4143_v48  ;;  %3547 = vmatpush3.bf16.msra.mxu1 %v4144_v49 }
 0x2e4   :  { %3526 = vmatprep.subr.bf16.mxu0 %v4145_v20  ;;  %3548 = vmatprep.subr.bf16.mxu1 %v4146_v51 }
 0x2e7   :  { %3527 = vmatpush3.bf16.msra.mxu0 %v4147_v52  ;;  %3549 = vmatpush3.bf16.msra.mxu1 %v4148_v53 }
 0x2e8   :  { %3528 = vmatprep.subr.bf16.mxu0 %v4149_v54  ;;  %3550 = vmatprep.subr.bf16.mxu1 %v4150_v55 }
 0x2eb   :  { %3529 = vmatpush3.bf16.msra.mxu0 %v4151_v57  ;;  %3551 = vmatpush3.bf16.msra.mxu1 %v4152_v59 }
 0x2ec   :  { %3530 = vmatprep.subr.bf16.mxu0 %v4153_v60  ;;  %3552 = vmatprep.subr.bf16.mxu1 %v4154_v61 }
 0x2ef   :  { %3531 = vmatpush3.bf16.msra.mxu0 %v4155_v62  ;;  %3553 = vmatpush3.bf16.msra.mxu1 %v4156_v63 }
 0x2f0   :  { %3532 = vmatprep.subr.bf16.mxu0 %v4157_v0  ;;  %3554 = vmatprep.subr.bf16.mxu1 %v4158_v1 }
 0x2f3   :  { %3533 = vmatpush3.bf16.msra.mxu0 %v4159_v2  ;;  %3555 = vmatpush3.bf16.msra.mxu1 %v4160_v42 }
 0x2f4   :  { %3534 = vmatprep.subr.bf16.mxu0 %v4161_v3  ;;  %3556 = vmatprep.subr.bf16.mxu1 %v4162_v5 }
 0x2f7   :  { %3535 = vmatpush3.bf16.msra.mxu0 %v4163_v6  ;;  %3557 = vmatpush3.bf16.msra.mxu1 %v4164_v7 }
 0x2f8   :  { %3536 = vmatprep.subr.bf16.mxu0 %v4165_v8  ;;  %3558 = vmatprep.subr.bf16.mxu1 %v4166_v9 }
 0x2fb   :  { %3537 = vmatpush3.bf16.msra.mxu0 %v4167_v44  ;;  %3559 = vmatpush3.bf16.msra.mxu1 %v4168_v10 }
 0x2fc   :  { %3538 = vmatprep.subr.bf16.mxu0 %v4169_v11  ;;  %3560 = vmatprep.subr.bf16.mxu1 %v4170_v12 }
 0x2ff   :  { %3539 = vmatpush3.bf16.msra.mxu0 %v4171_v13  ;;  %3561 = vmatpush3.bf16.msra.mxu1 %v4172_v4 }
 0x3b5   :  { %v2691_v21 = vpop.f32.mrb[8].mxu0  ;;  %v2773_v22 = vpop.f32.mrb[8].mxu1 }
 0x3b6   :  { %v3576_v23 = vadd.f32 %v2691_v21, %v1959_v16  ;;  %v3578_v24 = vadd.f32 %v2773_v22, %v1967_v17  ;;  %v2693_v25 = vpop.f32.mrb[9].mxu0  ;;  %v2775_v26 = vpop.f32.mrb[9].mxu1 }
 0x3b7   :  { %v3577_v27 = vadd.f32 %v2693_v25, %v1963_v18  ;;  %v3579_v28 = vadd.f32 %v2775_v26, %v1971_v19  ;;  %v2695_v29 = vpop.f32.mrb[10].mxu0  ;;  %v2777_v30 = vpop.f32.mrb[10].mxu1 }
 0x3b8   :  { %v2780_v31 = vmax.f32 %v3576_v23, 0.0  ;;  %v2782_v32 = vmax.f32 %v3578_v24, 0.0  ;;  %v2696_v33 = vpop.f32.mrb[11].mxu0  ;;  %v2778_v43 = vpop.f32.mrb[11].mxu1 }
 0x3b9   :  { %v2781_v34 = vmax.f32 %v3577_v27, 0.0  ;;  %v2783_v58 = vmax.f32 %v3579_v28, 0.0 }
 0x3ba   :  { %v2784_v36 = vpack.c.bf16 %v2780_v31, %v2780_v31  ;;  %v2786_v56 = vpack.c.bf16 %v2782_v32, %v2782_v32 }
 0x3bb   :  { %v2785_v35 = vpack.c.bf16 %v2781_v34, %v2781_v34  ;;  %v2787_v45 = vpack.c.bf16 %v2783_v58, %v2783_v58 }
 0x3bd   :  { %3083 = vmatprep.mubr.bf16.mxu0 %v2785_v35  ;;  %3123 = vmatprep.mubr.bf16.mxu1 %v2787_v45 }
 0x3be   :  { %3084 = vmatmul.mubr.bf16.vlgmr.msra.gmra.mrb[12].mxu0 %v2784_v36  ;;  %3124 = vmatmul.mubr.bf16.vlgmr.msra.gmra.mrb[12].mxu1 %v2786_v56 }
 0x491   :  { %v3540_v37 = vpop.f32.mrb[12].mxu0  ;;  %v3562_v38 = vpop.f32.mrb[12].mxu1 }
 0x492   :  { %v3541_v40 = vpop.f32.mrb[13].mxu0  ;;  %v3563_v41 = vpop.f32.mrb[13].mxu1 }
 0x493   :  { %v3542_v46 = vadd.f32 %v3541_v40, %v3540_v37  ;;  %v3564_v15 = vadd.f32 %v3563_v41, %v3562_v38  ;;  %v3543_v47 = vpop.f32.mrb[14].mxu0  ;;  %v3565_v48 = vpop.f32.mrb[14].mxu1 }
 0x494   :  { %v3544_v49 = vpop.f32.mrb[15].mxu0  ;;  %v3566_v50 = vpop.f32.mrb[15].mxu1 }
 0x495   :  { %v3086_v20 = vadd.f32 %v3542_v46, %v3491_v39 }
 0x497   :  { %v3126_v51 = vadd.f32 %v3564_v15, %v3086_v20 }
 0x499   :  { %3131 = vst [vmem:[%s4474_s9] sm:$0xff] %v3126_v51 }
 0x49a   :  { %3136 = vsyncpa [#allocation3], 1 }
 0x49b   :  { %3137 = vsyncpa [#allocation5], 1 }
 0x49c   :  { %3138 = vsyncpa [#allocation8], 1 }

</bundles_post_ra>
